<compile_context>
chip_gen: v5e
topology: v5e:2x2
jax: 0.10.0
libtpu: 0.0.40
codegen_flags: <defaults>
</compile_context>

<pallas_src>
import functools

import jax
import jax.numpy as jnp
from jax.experimental import pallas as pl
from jax.experimental.pallas import tpu as pltpu


# ----------------------------------------------------------------------------
# Pallas kernels
# ----------------------------------------------------------------------------
def _conv1_kernel(xm_ref, x0_ref, xp_ref, w_ref, y_ref, st_ref, *, H, C2):
    """Sub-pixel ConvTranspose2d(k=4,s=2,p=1) for one input row.

    Inputs: the three tap rows (o-1, o, o+1) of the NHWC input (each (1,1,W,Cin)) and
    the packed weight (9*Cin, 4*C2).  Output: the two upsampled rows (2o, 2o+1) in
    column-parity-packed layout (1, 2, W, 2*C2) plus BN1 partial sums / sums-of-squares
    over the raw f32 conv output (1, 1, 2, 4*C2).
    """
    o = pl.program_id(1)
    taps = []
    for u, r_ref in enumerate((xm_ref, x0_ref, xp_ref)):
        row = r_ref[0, 0]                                   # (W, Cin) bf16
        if u == 0:
            row = row * (o >= 1).astype(row.dtype)          # zero row padding (top)
        elif u == 2:
            row = row * (o <= H - 2).astype(row.dtype)      # zero row padding (bottom)
        w = row.shape[0]
        zero = jnp.zeros((1, row.shape[1]), row.dtype)
        rp = jnp.concatenate([zero, row, zero], axis=0)     # (W+2, Cin): zero col padding
        taps.append(jnp.concatenate([rp[v:v + w] for v in range(3)], axis=-1))
    patches = jnp.concatenate(taps, axis=-1)                # (W, 9*Cin)
    acc = jnp.dot(patches, w_ref[...], preferred_element_type=jnp.float32)   # (W, 4*C2)

    # BN1 partial statistics (per packed column; folded per-channel outside).
    st_ref[0, 0, 0:1, :] = jnp.sum(acc, axis=0, keepdims=True)
    st_ref[0, 0, 1:2, :] = jnp.sum(acc * acc, axis=0, keepdims=True)

    # Column-parity-packed store: upsampled row 2o+r holds acc columns [2r*C2, 2r*C2+2*C2).
    y_ref[0, 0] = acc[:, 0:2 * C2].astype(y_ref.dtype)
    y_ref[0, 1] = acc[:, 2 * C2:4 * C2].astype(y_ref.dtype)


def _conv2_kernel(ym_ref, y0_ref, yp_ref, sc_ref, sh_ref, w_ref, o_ref, st_ref, *, H2):
    """Conv2d(k=3,p=1) over the column-parity-packed conv1 output, one output row.

    BN1's affine + ReLU (per packed channel scale/shift) is applied on the fly to each
    gathered tap row, so the normalized conv1 activation never hits HBM.  Output stays
    packed: (1, 1, W, 2*Cout); BN2 partial stats: (1, 1, 2, 2*Cout).
    """
    t = pl.program_id(1)
    taps = []
    for di, r_ref in enumerate((ym_ref, y0_ref, yp_ref)):
        u = jnp.maximum(r_ref[0, 0].astype(jnp.float32) * sc_ref[...] + sh_ref[...], 0.0)
        if di == 0:
            u = u * (t >= 1).astype(u.dtype)                # zero row padding (top)
        elif di == 2:
            u = u * (t <= H2 - 2).astype(u.dtype)           # zero row padding (bottom)
        u = u.astype(jnp.bfloat16)                          # (W, 2*C2)
        w = u.shape[0]
        zero = jnp.zeros((1, u.shape[1]), u.dtype)
        up = jnp.concatenate([zero, u, zero], axis=0)       # (W+2, 2*C2): zero col padding
        taps.append(jnp.concatenate([up[e:e + w] for e in range(3)], axis=-1))
    patches = jnp.concatenate(taps, axis=-1)                # (W, 18*C2)
    acc = jnp.dot(patches, w_ref[...], preferred_element_type=jnp.float32)   # (W, 2*Cout)

    st_ref[0, 0, 0:1, :] = jnp.sum(acc, axis=0, keepdims=True)
    st_ref[0, 0, 1:2, :] = jnp.sum(acc * acc, axis=0, keepdims=True)
    o_ref[0, 0] = acc.astype(o_ref.dtype)


def _affine_relu_kernel(x_ref, s_ref, b_ref, o_ref):
    """o = relu(x * scale + shift) with per-column scale/shift."""
    y = x_ref[...].astype(jnp.float32) * s_ref[...] + b_ref[...]
    o_ref[...] = jnp.maximum(y, 0.0).astype(o_ref.dtype)


# ----------------------------------------------------------------------------
# Kernel wrappers
# ----------------------------------------------------------------------------
def _conv1_call(x, w1c, C2):
    B, H, W, Cin = x.shape
    kernel = functools.partial(_conv1_kernel, H=H, C2=C2)
    return pl.pallas_call(
        kernel,
        grid=(B, H),
        in_specs=[
            pl.BlockSpec((1, 1, W, Cin), lambda b, o: (b, jnp.maximum(o - 1, 0), 0, 0)),
            pl.BlockSpec((1, 1, W, Cin), lambda b, o: (b, o, 0, 0)),
            pl.BlockSpec((1, 1, W, Cin), lambda b, o: (b, jnp.minimum(o + 1, H - 1), 0, 0)),
            pl.BlockSpec(w1c.shape, lambda b, o: (0, 0)),
        ],
        out_specs=(
            pl.BlockSpec((1, 2, W, 2 * C2), lambda b, o: (b, o, 0, 0)),
            pl.BlockSpec((1, 1, 2, 4 * C2), lambda b, o: (b, o, 0, 0)),
        ),
        out_shape=(
            jax.ShapeDtypeStruct((B, 2 * H, W, 2 * C2), jnp.bfloat16),
            jax.ShapeDtypeStruct((B, H, 2, 4 * C2), jnp.float32),
        ),
        compiler_params=pltpu.CompilerParams(
            dimension_semantics=("parallel", "parallel"),
            vmem_limit_bytes=32 * 1024 * 1024,
        ),
    )(x, x, x, w1c)


def _conv2_call(y1, scale1p, shift1p, w2p, Cout):
    B, H2, W, twoC2 = y1.shape
    kernel = functools.partial(_conv2_kernel, H2=H2)
    return pl.pallas_call(
        kernel,
        grid=(B, H2),
        in_specs=[
            pl.BlockSpec((1, 1, W, twoC2), lambda b, t: (b, jnp.maximum(t - 1, 0), 0, 0)),
            pl.BlockSpec((1, 1, W, twoC2), lambda b, t: (b, t, 0, 0)),
            pl.BlockSpec((1, 1, W, twoC2), lambda b, t: (b, jnp.minimum(t + 1, H2 - 1), 0, 0)),
            pl.BlockSpec(scale1p.shape, lambda b, t: (0, 0)),
            pl.BlockSpec(shift1p.shape, lambda b, t: (0, 0)),
            pl.BlockSpec(w2p.shape, lambda b, t: (0, 0)),
        ],
        out_specs=(
            pl.BlockSpec((1, 1, W, 2 * Cout), lambda b, t: (b, t, 0, 0)),
            pl.BlockSpec((1, 1, 2, 2 * Cout), lambda b, t: (b, t, 0, 0)),
        ),
        out_shape=(
            jax.ShapeDtypeStruct((B, H2, W, 2 * Cout), jnp.bfloat16),
            jax.ShapeDtypeStruct((B, H2, 2, 2 * Cout), jnp.float32),
        ),
        compiler_params=pltpu.CompilerParams(
            dimension_semantics=("parallel", "parallel"),
            vmem_limit_bytes=32 * 1024 * 1024,
        ),
    )(y1, y1, y1, scale1p, shift1p, w2p)


def pallas_affine_relu(x, scale, shift, out_dtype, vmem_budget_bytes=8 << 20):
    """Row-tiled fused (x * scale + shift) -> ReLU; tile derived from a VMEM budget."""
    R, C = x.shape
    per_row = 2 * C * (x.dtype.itemsize + jnp.dtype(out_dtype).itemsize)  # double-buffered in+out
    cap = max(8, vmem_budget_bytes // max(per_row, 1))
    if R <= cap:
        tm = R
    else:
        tm = max(8, (cap // 8) * 8)
        while tm > 8 and R % tm != 0:
            tm -= 8
        if R % tm != 0:
            tm = R  # fallback: single block (still correct)
    return pl.pallas_call(
        _affine_relu_kernel,
        grid=(R // tm,),
        in_specs=[
            pl.BlockSpec((tm, C), lambda m: (m, 0)),
            pl.BlockSpec((1, C), lambda m: (0, 0)),
            pl.BlockSpec((1, C), lambda m: (0, 0)),
        ],
        out_specs=pl.BlockSpec((tm, C), lambda m: (m, 0)),
        out_shape=jax.ShapeDtypeStruct((R, C), out_dtype),
        compiler_params=pltpu.CompilerParams(
            dimension_semantics=("parallel",),
            vmem_limit_bytes=32 * 1024 * 1024,
        ),
    )(x, scale, shift)


def _bn_scale_shift(stats, n_groups, count, gamma, beta, eps=1e-5):
    """Fold per-step packed-column BN stats into per-channel scale/shift (training BN)."""
    c = gamma.shape[0]
    s = stats.reshape(-1, 2, stats.shape[-1]).sum(axis=0)        # (2, n_groups*c)
    ssum = s[0].reshape(n_groups, c).sum(axis=0)
    ssq = s[1].reshape(n_groups, c).sum(axis=0)
    mean = ssum / count
    var = ssq / count - mean * mean                              # biased var (PyTorch training BN)
    scale = gamma * jax.lax.rsqrt(var + eps)
    shift = beta - mean * scale
    return scale, shift


# ----------------------------------------------------------------------------
# Weight packing (done once at init)
# ----------------------------------------------------------------------------
def _convt_subpixel_weight(w_t):
    """Pack ConvTranspose2d(k=4,s=2,p=1) weight (Cin, C2, 4, 4) into a (9*Cin, 4*C2)
    matmul weight over 3x3 taps of the 1-padded input; output column q*C2+m (q=2r+c)
    holds sub-pixel parity (r, c) of channel m."""
    c_in, c2, kh, kw = w_t.shape
    assert kh == 4 and kw == 4
    wc = jnp.zeros((3, 3, c_in, 4 * c2), w_t.dtype)
    for r in range(2):
        for c in range(2):
            q = 2 * r + c
            for du in range(2):
                for dv in range(2):
                    u, v = r + du, c + dv
                    kr, kc = 3 - r - 2 * du, 3 - c - 2 * dv
                    wc = wc.at[u, v, :, q * c2:(q + 1) * c2].set(w_t[:, :, kr, kc])
    return wc.reshape(9 * c_in, 4 * c2)


def _conv2_packed_weight(w2):
    """Pack Conv2d(k=3,p=1) weight (Cout, C2, 3, 3) for the column-parity-packed layout.

    Rows indexed (di, e, cc, m): 3 row taps x 3 packed-column neighbors x 2 input
    parities x C2 channels; columns (c, m'): 2 output parities x Cout.  The column tap
    dj used is dj = 2*e + cc - c - 1 (zero weight when dj is out of [0, 2])."""
    c_out, c2, _, _ = w2.shape
    wp = jnp.zeros((3, 3, 2, c2, 2, c_out), w2.dtype)
    for e in range(3):
        for cc in range(2):
            for c in range(2):
                dj = 2 * e + cc - c - 1
                if 0 <= dj <= 2:
                    wp = wp.at[:, e, cc, :, c, :].set(
                        jnp.transpose(w2[:, :, :, dj], (2, 1, 0)))
    return wp.reshape(18 * c2, 2 * c_out)


# ----------------------------------------------------------------------------
# Parameters & forward pass
# ----------------------------------------------------------------------------
def init_params(key, in_channels, out_channels):
    k1, k2 = jax.random.split(key)
    c2 = out_channels * 2
    w1 = 0.02 * jax.random.normal(k1, (in_channels, c2, 4, 4), jnp.float32)   # ConvT: (Cin, C2, kh, kw)
    w2 = 0.02 * jax.random.normal(k2, (out_channels, c2, 3, 3), jnp.float32)  # Conv:  (Cout, C2, kh, kw)
    return {
        "w1_raw": w1,
        "w2_raw": w2,
        "w1c": _convt_subpixel_weight(w1).astype(jnp.bfloat16),   # (9*Cin, 4*C2)
        "w2p": _conv2_packed_weight(w2).astype(jnp.bfloat16),     # (18*C2, 2*Cout)
        "gamma1": jnp.ones((c2,), jnp.float32),
        "beta1": jnp.zeros((c2,), jnp.float32),
        "gamma2": jnp.ones((out_channels,), jnp.float32),
        "beta2": jnp.zeros((out_channels,), jnp.float32),
    }


def upsampling_block_forward(params, x_nchw):
    x = jnp.transpose(x_nchw, (0, 2, 3, 1)).astype(jnp.bfloat16)      # NHWC, bf16
    B, H, W, _ = x.shape
    C2 = params["gamma1"].shape[0]
    Cout = params["gamma2"].shape[0]
    H2 = 2 * H
    count = B * (2 * H) * (2 * W)                                     # elements per channel

    # conv1 (sub-pixel ConvTranspose2d) + fused BN1 statistics; packed output (B,2H,W,2*C2)
    y1, st1 = _conv1_call(x, params["w1c"], C2)

    scale1, shift1 = _bn_scale_shift(st1, 4, count, params["gamma1"], params["beta1"])
    scale1p = jnp.tile(scale1, 2).reshape(1, 2 * C2).astype(jnp.float32)
    shift1p = jnp.tile(shift1, 2).reshape(1, 2 * C2).astype(jnp.float32)

    # conv2 with BN1 affine+ReLU fused into its tap gather, + fused BN2 statistics
    y2, st2 = _conv2_call(y1, scale1p, shift1p, params["w2p"], Cout)  # (B,2H,W,2*Cout) bf16

    scale2, shift2 = _bn_scale_shift(st2, 2, count, params["gamma2"], params["beta2"])
    scale2v = jnp.tile(scale2, 2 * W).reshape(1, W * 2 * Cout).astype(jnp.float32)
    shift2v = jnp.tile(shift2, 2 * W).reshape(1, W * 2 * Cout).astype(jnp.float32)

    # BN2 affine + ReLU epilogue over a lane-dense 2-D view (contiguous reshape, no copy)
    y2f = y2.reshape(B * H2, W * 2 * Cout)
    o = pallas_affine_relu(y2f, scale2v, shift2v, jnp.bfloat16)

    # un-pack the column parities (contiguous reshape) and convert to NCHW f32
    out = o.reshape(B, H2, 2 * W, Cout).astype(jnp.float32)
    return jnp.transpose(out, (0, 3, 1, 2))


# ----------------------------------------------------------------------------
# Pure-JAX f32 reference (training-mode BN, biases dropped as they cancel)
# ----------------------------------------------------------------------------
def reference_forward(params, x_nchw):
    eps = 1e-5

    def bn_relu(y, gamma, beta):
        mean = jnp.mean(y, axis=(0, 2, 3), keepdims=True)
        var = jnp.mean(jnp.square(y - mean), axis=(0, 2, 3), keepdims=True)
        yh = (y - mean) * jax.lax.rsqrt(var + eps)
        yh = yh * gamma.reshape(1, -1, 1, 1) + beta.reshape(1, -1, 1, 1)
        return jnp.maximum(yh, 0.0)

    w1c = jnp.transpose(params["w1_raw"], (1, 0, 2, 3))[:, :, ::-1, ::-1]   # OIHW, flipped
    y = jax.lax.conv_general_dilated(
        x_nchw, w1c, window_strides=(1, 1), padding=((2, 2), (2, 2)),
        lhs_dilation=(2, 2), dimension_numbers=("NCHW", "OIHW", "NCHW"))
    y = bn_relu(y, params["gamma1"], params["beta1"])
    y = jax.lax.conv_general_dilated(
        y, params["w2_raw"], window_strides=(1, 1), padding=((1, 1), (1, 1)),
        dimension_numbers=("NCHW", "OIHW", "NCHW"))
    return bn_relu(y, params["gamma2"], params["beta2"])


if __name__ == "__main__":
    B, C_IN, C_OUT, H, W = 2, 8, 8, 16, 16

    key = jax.random.PRNGKey(0)
    pkey, xkey = jax.random.split(key)
    params = init_params(pkey, C_IN, C_OUT)
    x = jax.random.normal(xkey, (B, C_IN, H, W), jnp.float32)

    fwd = jax.jit(functools.partial(upsampling_block_forward, params))
    out = fwd(x)
    jax.block_until_ready(out)

    assert out.shape == (B, C_OUT, 2 * H, 2 * W)
    assert bool(jnp.all(out >= 0.0))     # ReLU output

    ref = reference_forward(params, x)
    err = float(jnp.max(jnp.abs(out - ref)))
    assert err < 0.25, f"kernel deviates from f32 reference: max abs err {err}"

    print("KERNEL_OK")
</pallas_src>

<mosaic_0001>
module attributes {stable_mosaic.version = 11 : i64} {
  func.func @_conv1_kernel(%arg0: i32, %arg1: i32, %arg2: memref<1x1x16x8xbf16, #tpu.memory_space<vmem>>, %arg3: memref<1x1x16x8xbf16, #tpu.memory_space<vmem>>, %arg4: memref<1x1x16x8xbf16, #tpu.memory_space<vmem>>, %arg5: memref<72x64xbf16, #tpu.memory_space<vmem>>, %arg6: memref<1x2x16x32xbf16, #tpu.memory_space<vmem>>, %arg7: memref<1x1x2x64xf32, #tpu.memory_space<vmem>>) attributes {dimension_semantics = [#tpu.dimension_semantics<parallel>, #tpu.dimension_semantics<parallel>], iteration_bounds = array<i64: 2, 16>, scalar_prefetch = 0 : i64, scratch_operands = 0 : i64, tpu.core_type = #tpu.core_type<tc>, window_params = [{transform_indices = @transform_0, window_bounds = array<i64: 1, 1, 16, 8>}, {transform_indices = @transform_1, window_bounds = array<i64: 1, 1, 16, 8>}, {transform_indices = @transform_2, window_bounds = array<i64: 1, 1, 16, 8>}, {pipeline_mode = #tpu.pipeline_mode<synchronous>, transform_indices = @transform_3, window_bounds = array<i64: 72, 64>}, {transform_indices = @transform_4, window_bounds = array<i64: 1, 2, 16, 32>}, {transform_indices = @transform_5, window_bounds = array<i64: 1, 1, 2, 64>}]} {
    %c0 = arith.constant 0 : index
    %c0_0 = arith.constant 0 : index
    %c0_1 = arith.constant 0 : index
    %c0_2 = arith.constant 0 : index
    %0 = vector.load %arg2[%c0, %c0_0, %c0_1, %c0_2] : memref<1x1x16x8xbf16, #tpu.memory_space<vmem>>, vector<1x1x16x8xbf16>
    %1 = vector.shape_cast %0 : vector<1x1x16x8xbf16> to vector<16x8xbf16>
    %c1_i32 = arith.constant 1 : i32
    %2 = arith.cmpi sge, %arg1, %c1_i32 : i32
    %3 = arith.extui %2 : i1 to i32
    %4 = arith.sitofp %3 : i32 to f32
    %5 = arith.truncf %4 : f32 to bf16
    %6 = vector.broadcast %5 : bf16 to vector<16x8xbf16>
    %7 = arith.mulf %1, %6 : vector<16x8xbf16>
    %cst = arith.constant 0.000000e+00 : bf16
    %8 = vector.broadcast %cst : bf16 to vector<1x8xbf16>
    %9 = tpu.concatenate %8, %7, %8 in 0 : vector<1x8xbf16>, vector<16x8xbf16>, vector<1x8xbf16> -> vector<18x8xbf16>
    %10 = vector.extract_strided_slice %9 {offsets = [0, 0], sizes = [16, 8], strides = [1, 1]} : vector<18x8xbf16> to vector<16x8xbf16>
    %11 = vector.extract_strided_slice %9 {offsets = [1, 0], sizes = [16, 8], strides = [1, 1]} : vector<18x8xbf16> to vector<16x8xbf16>
    %12 = vector.extract_strided_slice %9 {offsets = [2, 0], sizes = [16, 8], strides = [1, 1]} : vector<18x8xbf16> to vector<16x8xbf16>
    %13 = tpu.concatenate %10, %11, %12 in 1 : vector<16x8xbf16>, vector<16x8xbf16>, vector<16x8xbf16> -> vector<16x24xbf16>
    %c0_3 = arith.constant 0 : index
    %c0_4 = arith.constant 0 : index
    %c0_5 = arith.constant 0 : index
    %c0_6 = arith.constant 0 : index
    %14 = vector.load %arg3[%c0_3, %c0_4, %c0_5, %c0_6] : memref<1x1x16x8xbf16, #tpu.memory_space<vmem>>, vector<1x1x16x8xbf16>
    %15 = vector.shape_cast %14 : vector<1x1x16x8xbf16> to vector<16x8xbf16>
    %cst_7 = arith.constant 0.000000e+00 : bf16
    %16 = vector.broadcast %cst_7 : bf16 to vector<1x8xbf16>
    %17 = tpu.concatenate %16, %15, %16 in 0 : vector<1x8xbf16>, vector<16x8xbf16>, vector<1x8xbf16> -> vector<18x8xbf16>
    %18 = vector.extract_strided_slice %17 {offsets = [0, 0], sizes = [16, 8], strides = [1, 1]} : vector<18x8xbf16> to vector<16x8xbf16>
    %19 = vector.extract_strided_slice %17 {offsets = [1, 0], sizes = [16, 8], strides = [1, 1]} : vector<18x8xbf16> to vector<16x8xbf16>
    %20 = vector.extract_strided_slice %17 {offsets = [2, 0], sizes = [16, 8], strides = [1, 1]} : vector<18x8xbf16> to vector<16x8xbf16>
    %21 = tpu.concatenate %18, %19, %20 in 1 : vector<16x8xbf16>, vector<16x8xbf16>, vector<16x8xbf16> -> vector<16x24xbf16>
    %c0_8 = arith.constant 0 : index
    %c0_9 = arith.constant 0 : index
    %c0_10 = arith.constant 0 : index
    %c0_11 = arith.constant 0 : index
    %22 = vector.load %arg4[%c0_8, %c0_9, %c0_10, %c0_11] : memref<1x1x16x8xbf16, #tpu.memory_space<vmem>>, vector<1x1x16x8xbf16>
    %23 = vector.shape_cast %22 : vector<1x1x16x8xbf16> to vector<16x8xbf16>
    %c14_i32 = arith.constant 14 : i32
    %24 = arith.cmpi sle, %arg1, %c14_i32 : i32
    %25 = arith.extui %24 : i1 to i32
    %26 = arith.sitofp %25 : i32 to f32
    %27 = arith.truncf %26 : f32 to bf16
    %28 = vector.broadcast %27 : bf16 to vector<16x8xbf16>
    %29 = arith.mulf %23, %28 : vector<16x8xbf16>
    %cst_12 = arith.constant 0.000000e+00 : bf16
    %30 = vector.broadcast %cst_12 : bf16 to vector<1x8xbf16>
    %31 = tpu.concatenate %30, %29, %30 in 0 : vector<1x8xbf16>, vector<16x8xbf16>, vector<1x8xbf16> -> vector<18x8xbf16>
    %32 = vector.extract_strided_slice %31 {offsets = [0, 0], sizes = [16, 8], strides = [1, 1]} : vector<18x8xbf16> to vector<16x8xbf16>
    %33 = vector.extract_strided_slice %31 {offsets = [1, 0], sizes = [16, 8], strides = [1, 1]} : vector<18x8xbf16> to vector<16x8xbf16>
    %34 = vector.extract_strided_slice %31 {offsets = [2, 0], sizes = [16, 8], strides = [1, 1]} : vector<18x8xbf16> to vector<16x8xbf16>
    %35 = tpu.concatenate %32, %33, %34 in 1 : vector<16x8xbf16>, vector<16x8xbf16>, vector<16x8xbf16> -> vector<16x24xbf16>
    %36 = tpu.concatenate %13, %21, %35 in 1 : vector<16x24xbf16>, vector<16x24xbf16>, vector<16x24xbf16> -> vector<16x72xbf16>
    %c0_13 = arith.constant 0 : index
    %c0_14 = arith.constant 0 : index
    %37 = vector.load %arg5[%c0_13, %c0_14] : memref<72x64xbf16, #tpu.memory_space<vmem>>, vector<72x64xbf16>
    %cst_15 = arith.constant dense<0.000000e+00> : vector<16x64xf32>
    %38 = tpu.matmul %36, %37, %cst_15 {dimension_numbers = #tpu.dot_dimension_numbers<[1], [0], [0], [1], [0, 0, 1, 1], [], []>} : vector<16x72xbf16>, vector<72x64xbf16>, vector<16x64xf32> -> vector<16x64xf32>
    %cst_16 = arith.constant dense<0.000000e+00> : vector<64xf32>
    %39 = vector.multi_reduction <add>, %38, %cst_16 [0] : vector<16x64xf32> to vector<64xf32>
    %40 = vector.shape_cast %39 : vector<64xf32> to vector<1x64xf32>
    %c0_17 = arith.constant 0 : index
    %c0_18 = arith.constant 0 : index
    %c0_19 = arith.constant 0 : index
    %c0_20 = arith.constant 0 : index
    %41 = vector.load %arg7[%c0_17, %c0_18, %c0_19, %c0_20] : memref<1x1x2x64xf32, #tpu.memory_space<vmem>>, vector<1x1x1x64xf32>
    %42 = vector.shape_cast %41 : vector<1x1x1x64xf32> to vector<1x64xf32>
    %43 = vector.shape_cast %40 : vector<1x64xf32> to vector<1x1x1x64xf32>
    tpu.vector_store %arg7[%c0_17, %c0_18, %c0_19, %c0_20], %43 {strides = array<i32>} : memref<1x1x2x64xf32, #tpu.memory_space<vmem>>, vector<1x1x1x64xf32>,
    %44 = arith.mulf %38, %38 : vector<16x64xf32>
    %cst_21 = arith.constant dense<0.000000e+00> : vector<64xf32>
    %45 = vector.multi_reduction <add>, %44, %cst_21 [0] : vector<16x64xf32> to vector<64xf32>
    %46 = vector.shape_cast %45 : vector<64xf32> to vector<1x64xf32>
    %c0_22 = arith.constant 0 : index
    %c0_23 = arith.constant 0 : index
    %c1 = arith.constant 1 : index
    %c0_24 = arith.constant 0 : index
    %47 = vector.load %arg7[%c0_22, %c0_23, %c1, %c0_24] : memref<1x1x2x64xf32, #tpu.memory_space<vmem>>, vector<1x1x1x64xf32>
    %48 = vector.shape_cast %47 : vector<1x1x1x64xf32> to vector<1x64xf32>
    %49 = vector.shape_cast %46 : vector<1x64xf32> to vector<1x1x1x64xf32>
    tpu.vector_store %arg7[%c0_22, %c0_23, %c1, %c0_24], %49 {strides = array<i32>} : memref<1x1x2x64xf32, #tpu.memory_space<vmem>>, vector<1x1x1x64xf32>,
    %50 = vector.extract_strided_slice %38 {offsets = [0, 0], sizes = [16, 32], strides = [1, 1]} : vector<16x64xf32> to vector<16x32xf32>
    %51 = arith.truncf %50 : vector<16x32xf32> to vector<16x32xbf16>
    %c0_25 = arith.constant 0 : index
    %c0_26 = arith.constant 0 : index
    %c0_27 = arith.constant 0 : index
    %c0_28 = arith.constant 0 : index
    %52 = vector.load %arg6[%c0_25, %c0_26, %c0_27, %c0_28] : memref<1x2x16x32xbf16, #tpu.memory_space<vmem>>, vector<1x1x16x32xbf16>
    %53 = vector.shape_cast %52 : vector<1x1x16x32xbf16> to vector<16x32xbf16>
    %54 = vector.shape_cast %51 : vector<16x32xbf16> to vector<1x1x16x32xbf16>
    tpu.vector_store %arg6[%c0_25, %c0_26, %c0_27, %c0_28], %54 {strides = array<i32>} : memref<1x2x16x32xbf16, #tpu.memory_space<vmem>>, vector<1x1x16x32xbf16>,
    %55 = vector.extract_strided_slice %38 {offsets = [0, 32], sizes = [16, 32], strides = [1, 1]} : vector<16x64xf32> to vector<16x32xf32>
    %56 = arith.truncf %55 : vector<16x32xf32> to vector<16x32xbf16>
    %c0_29 = arith.constant 0 : index
    %c1_30 = arith.constant 1 : index
    %c0_31 = arith.constant 0 : index
    %c0_32 = arith.constant 0 : index
    %57 = vector.load %arg6[%c0_29, %c1_30, %c0_31, %c0_32] : memref<1x2x16x32xbf16, #tpu.memory_space<vmem>>, vector<1x1x16x32xbf16>
    %58 = vector.shape_cast %57 : vector<1x1x16x32xbf16> to vector<16x32xbf16>
    %59 = vector.shape_cast %56 : vector<16x32xbf16> to vector<1x1x16x32xbf16>
    tpu.vector_store %arg6[%c0_29, %c1_30, %c0_31, %c0_32], %59 {strides = array<i32>} : memref<1x2x16x32xbf16, #tpu.memory_space<vmem>>, vector<1x1x16x32xbf16>,
    return
  }
  func.func @transform_0(%arg0: i32, %arg1: i32) -> (i32, i32, i32, i32) {
    %c1_i32 = arith.constant 1 : i32
    %0 = arith.subi %arg1, %c1_i32 : i32
    %c0_i32 = arith.constant 0 : i32
    %1 = arith.maxsi %0, %c0_i32 : i32
    %c0_i32_0 = arith.constant 0 : i32
    %c0_i32_1 = arith.constant 0 : i32
    %c0_i32_2 = arith.constant 0 : i32
    return %arg0, %1, %c0_i32_0, %c0_i32_1 : i32, i32, i32, i32
  }
  func.func @transform_1(%arg0: i32, %arg1: i32) -> (i32, i32, i32, i32) {
    %c0_i32 = arith.constant 0 : i32
    %c0_i32_0 = arith.constant 0 : i32
    %c0_i32_1 = arith.constant 0 : i32
    return %arg0, %arg1, %c0_i32, %c0_i32_0 : i32, i32, i32, i32
  }
  func.func @transform_2(%arg0: i32, %arg1: i32) -> (i32, i32, i32, i32) {
    %c1_i32 = arith.constant 1 : i32
    %0 = arith.addi %arg1, %c1_i32 : i32
    %c15_i32 = arith.constant 15 : i32
    %1 = arith.minsi %0, %c15_i32 : i32
    %c0_i32 = arith.constant 0 : i32
    %c0_i32_0 = arith.constant 0 : i32
    %c0_i32_1 = arith.constant 0 : i32
    return %arg0, %1, %c0_i32, %c0_i32_0 : i32, i32, i32, i32
  }
  func.func @transform_3(%arg0: i32, %arg1: i32) -> (i32, i32) {
    %c0_i32 = arith.constant 0 : i32
    %c0_i32_0 = arith.constant 0 : i32
    %c0_i32_1 = arith.constant 0 : i32
    return %c0_i32, %c0_i32_0 : i32, i32
  }
  func.func @transform_4(%arg0: i32, %arg1: i32) -> (i32, i32, i32, i32) {
    %c0_i32 = arith.constant 0 : i32
    %c0_i32_0 = arith.constant 0 : i32
    %c0_i32_1 = arith.constant 0 : i32
    return %arg0, %arg1, %c0_i32, %c0_i32_0 : i32, i32, i32, i32
  }
  func.func @transform_5(%arg0: i32, %arg1: i32) -> (i32, i32, i32, i32) {
    %c0_i32 = arith.constant 0 : i32
    %c0_i32_0 = arith.constant 0 : i32
    %c0_i32_1 = arith.constant 0 : i32
    return %arg0, %arg1, %c0_i32, %c0_i32_0 : i32, i32, i32, i32
  }
}

module attributes {stable_mosaic.version = 11 : i64} {
  func.func @_conv2_kernel(%arg0: i32, %arg1: i32, %arg2: memref<1x1x16x32xbf16, #tpu.memory_space<vmem>>, %arg3: memref<1x1x16x32xbf16, #tpu.memory_space<vmem>>, %arg4: memref<1x1x16x32xbf16, #tpu.memory_space<vmem>>, %arg5: memref<1x32xf32, #tpu.memory_space<vmem>>, %arg6: memref<1x32xf32, #tpu.memory_space<vmem>>, %arg7: memref<288x16xbf16, #tpu.memory_space<vmem>>, %arg8: memref<1x1x16x16xbf16, #tpu.memory_space<vmem>>, %arg9: memref<1x1x2x16xf32, #tpu.memory_space<vmem>>) attributes {dimension_semantics = [#tpu.dimension_semantics<parallel>, #tpu.dimension_semantics<parallel>], iteration_bounds = array<i64: 2, 32>, scalar_prefetch = 0 : i64, scratch_operands = 0 : i64, tpu.core_type = #tpu.core_type<tc>, window_params = [{transform_indices = @transform_0, window_bounds = array<i64: 1, 1, 16, 32>}, {transform_indices = @transform_1, window_bounds = array<i64: 1, 1, 16, 32>}, {transform_indices = @transform_2, window_bounds = array<i64: 1, 1, 16, 32>}, {pipeline_mode = #tpu.pipeline_mode<synchronous>, transform_indices = @transform_3, window_bounds = array<i64: 1, 32>}, {pipeline_mode = #tpu.pipeline_mode<synchronous>, transform_indices = @transform_4, window_bounds = array<i64: 1, 32>}, {pipeline_mode = #tpu.pipeline_mode<synchronous>, transform_indices = @transform_5, window_bounds = array<i64: 288, 16>}, {transform_indices = @transform_6, window_bounds = array<i64: 1, 1, 16, 16>}, {transform_indices = @transform_7, window_bounds = array<i64: 1, 1, 2, 16>}]} {
    %c0 = arith.constant 0 : index
    %c0_0 = arith.constant 0 : index
    %c0_1 = arith.constant 0 : index
    %c0_2 = arith.constant 0 : index
    %0 = vector.load %arg2[%c0, %c0_0, %c0_1, %c0_2] : memref<1x1x16x32xbf16, #tpu.memory_space<vmem>>, vector<1x1x16x32xbf16>
    %1 = vector.shape_cast %0 : vector<1x1x16x32xbf16> to vector<16x32xbf16>
    %2 = arith.extf %1 : vector<16x32xbf16> to vector<16x32xf32>
    %c0_3 = arith.constant 0 : index
    %c0_4 = arith.constant 0 : index
    %3 = vector.load %arg5[%c0_3, %c0_4] : memref<1x32xf32, #tpu.memory_space<vmem>>, vector<1x32xf32>
    %4 = vector.broadcast %3 : vector<1x32xf32> to vector<16x32xf32>
    %5 = arith.mulf %2, %4 : vector<16x32xf32>
    %c0_5 = arith.constant 0 : index
    %c0_6 = arith.constant 0 : index
    %6 = vector.load %arg6[%c0_5, %c0_6] : memref<1x32xf32, #tpu.memory_space<vmem>>, vector<1x32xf32>
    %7 = vector.broadcast %6 : vector<1x32xf32> to vector<16x32xf32>
    %8 = arith.addf %5, %7 : vector<16x32xf32>
    %cst = arith.constant 0.000000e+00 : f32
    %9 = vector.broadcast %cst : f32 to vector<16x32xf32>
    %10 = arith.maximumf %8, %9 : vector<16x32xf32>
    %c1_i32 = arith.constant 1 : i32
    %11 = arith.cmpi sge, %arg1, %c1_i32 : i32
    %12 = arith.extui %11 : i1 to i32
    %13 = arith.sitofp %12 : i32 to f32
    %14 = vector.broadcast %13 : f32 to vector<16x32xf32>
    %15 = arith.mulf %10, %14 : vector<16x32xf32>
    %16 = arith.truncf %15 : vector<16x32xf32> to vector<16x32xbf16>
    %cst_7 = arith.constant 0.000000e+00 : bf16
    %17 = vector.broadcast %cst_7 : bf16 to vector<1x32xbf16>
    %18 = tpu.concatenate %17, %16, %17 in 0 : vector<1x32xbf16>, vector<16x32xbf16>, vector<1x32xbf16> -> vector<18x32xbf16>
    %19 = vector.extract_strided_slice %18 {offsets = [0, 0], sizes = [16, 32], strides = [1, 1]} : vector<18x32xbf16> to vector<16x32xbf16>
    %20 = vector.extract_strided_slice %18 {offsets = [1, 0], sizes = [16, 32], strides = [1, 1]} : vector<18x32xbf16> to vector<16x32xbf16>
    %21 = vector.extract_strided_slice %18 {offsets = [2, 0], sizes = [16, 32], strides = [1, 1]} : vector<18x32xbf16> to vector<16x32xbf16>
    %22 = tpu.concatenate %19, %20, %21 in 1 : vector<16x32xbf16>, vector<16x32xbf16>, vector<16x32xbf16> -> vector<16x96xbf16>
    %c0_8 = arith.constant 0 : index
    %c0_9 = arith.constant 0 : index
    %c0_10 = arith.constant 0 : index
    %c0_11 = arith.constant 0 : index
    %23 = vector.load %arg3[%c0_8, %c0_9, %c0_10, %c0_11] : memref<1x1x16x32xbf16, #tpu.memory_space<vmem>>, vector<1x1x16x32xbf16>
    %24 = vector.shape_cast %23 : vector<1x1x16x32xbf16> to vector<16x32xbf16>
    %25 = arith.extf %24 : vector<16x32xbf16> to vector<16x32xf32>
    %c0_12 = arith.constant 0 : index
    %c0_13 = arith.constant 0 : index
    %26 = vector.load %arg5[%c0_12, %c0_13] : memref<1x32xf32, #tpu.memory_space<vmem>>, vector<1x32xf32>
    %27 = vector.broadcast %26 : vector<1x32xf32> to vector<16x32xf32>
    %28 = arith.mulf %25, %27 : vector<16x32xf32>
    %c0_14 = arith.constant 0 : index
    %c0_15 = arith.constant 0 : index
    %29 = vector.load %arg6[%c0_14, %c0_15] : memref<1x32xf32, #tpu.memory_space<vmem>>, vector<1x32xf32>
    %30 = vector.broadcast %29 : vector<1x32xf32> to vector<16x32xf32>
    %31 = arith.addf %28, %30 : vector<16x32xf32>
    %cst_16 = arith.constant 0.000000e+00 : f32
    %32 = vector.broadcast %cst_16 : f32 to vector<16x32xf32>
    %33 = arith.maximumf %31, %32 : vector<16x32xf32>
    %34 = arith.truncf %33 : vector<16x32xf32> to vector<16x32xbf16>
    %cst_17 = arith.constant 0.000000e+00 : bf16
    %35 = vector.broadcast %cst_17 : bf16 to vector<1x32xbf16>
    %36 = tpu.concatenate %35, %34, %35 in 0 : vector<1x32xbf16>, vector<16x32xbf16>, vector<1x32xbf16> -> vector<18x32xbf16>
    %37 = vector.extract_strided_slice %36 {offsets = [0, 0], sizes = [16, 32], strides = [1, 1]} : vector<18x32xbf16> to vector<16x32xbf16>
    %38 = vector.extract_strided_slice %36 {offsets = [1, 0], sizes = [16, 32], strides = [1, 1]} : vector<18x32xbf16> to vector<16x32xbf16>
    %39 = vector.extract_strided_slice %36 {offsets = [2, 0], sizes = [16, 32], strides = [1, 1]} : vector<18x32xbf16> to vector<16x32xbf16>
    %40 = tpu.concatenate %37, %38, %39 in 1 : vector<16x32xbf16>, vector<16x32xbf16>, vector<16x32xbf16> -> vector<16x96xbf16>
    %c0_18 = arith.constant 0 : index
    %c0_19 = arith.constant 0 : index
    %c0_20 = arith.constant 0 : index
    %c0_21 = arith.constant 0 : index
    %41 = vector.load %arg4[%c0_18, %c0_19, %c0_20, %c0_21] : memref<1x1x16x32xbf16, #tpu.memory_space<vmem>>, vector<1x1x16x32xbf16>
    %42 = vector.shape_cast %41 : vector<1x1x16x32xbf16> to vector<16x32xbf16>
    %43 = arith.extf %42 : vector<16x32xbf16> to vector<16x32xf32>
    %c0_22 = arith.constant 0 : index
    %c0_23 = arith.constant 0 : index
    %44 = vector.load %arg5[%c0_22, %c0_23] : memref<1x32xf32, #tpu.memory_space<vmem>>, vector<1x32xf32>
    %45 = vector.broadcast %44 : vector<1x32xf32> to vector<16x32xf32>
    %46 = arith.mulf %43, %45 : vector<16x32xf32>
    %c0_24 = arith.constant 0 : index
    %c0_25 = arith.constant 0 : index
    %47 = vector.load %arg6[%c0_24, %c0_25] : memref<1x32xf32, #tpu.memory_space<vmem>>, vector<1x32xf32>
    %48 = vector.broadcast %47 : vector<1x32xf32> to vector<16x32xf32>
    %49 = arith.addf %46, %48 : vector<16x32xf32>
    %cst_26 = arith.constant 0.000000e+00 : f32
    %50 = vector.broadcast %cst_26 : f32 to vector<16x32xf32>
    %51 = arith.maximumf %49, %50 : vector<16x32xf32>
    %c30_i32 = arith.constant 30 : i32
    %52 = arith.cmpi sle, %arg1, %c30_i32 : i32
    %53 = arith.extui %52 : i1 to i32
    %54 = arith.sitofp %53 : i32 to f32
    %55 = vector.broadcast %54 : f32 to vector<16x32xf32>
    %56 = arith.mulf %51, %55 : vector<16x32xf32>
    %57 = arith.truncf %56 : vector<16x32xf32> to vector<16x32xbf16>
    %cst_27 = arith.constant 0.000000e+00 : bf16
    %58 = vector.broadcast %cst_27 : bf16 to vector<1x32xbf16>
    %59 = tpu.concatenate %58, %57, %58 in 0 : vector<1x32xbf16>, vector<16x32xbf16>, vector<1x32xbf16> -> vector<18x32xbf16>
    %60 = vector.extract_strided_slice %59 {offsets = [0, 0], sizes = [16, 32], strides = [1, 1]} : vector<18x32xbf16> to vector<16x32xbf16>
    %61 = vector.extract_strided_slice %59 {offsets = [1, 0], sizes = [16, 32], strides = [1, 1]} : vector<18x32xbf16> to vector<16x32xbf16>
    %62 = vector.extract_strided_slice %59 {offsets = [2, 0], sizes = [16, 32], strides = [1, 1]} : vector<18x32xbf16> to vector<16x32xbf16>
    %63 = tpu.concatenate %60, %61, %62 in 1 : vector<16x32xbf16>, vector<16x32xbf16>, vector<16x32xbf16> -> vector<16x96xbf16>
    %64 = tpu.concatenate %22, %40, %63 in 1 : vector<16x96xbf16>, vector<16x96xbf16>, vector<16x96xbf16> -> vector<16x288xbf16>
    %c0_28 = arith.constant 0 : index
    %c0_29 = arith.constant 0 : index
    %65 = vector.load %arg7[%c0_28, %c0_29] : memref<288x16xbf16, #tpu.memory_space<vmem>>, vector<288x16xbf16>
    %cst_30 = arith.constant dense<0.000000e+00> : vector<16x16xf32>
    %66 = tpu.matmul %64, %65, %cst_30 {dimension_numbers = #tpu.dot_dimension_numbers<[1], [0], [0], [1], [0, 0, 1, 1], [], []>} : vector<16x288xbf16>, vector<288x16xbf16>, vector<16x16xf32> -> vector<16x16xf32>
    %cst_31 = arith.constant dense<0.000000e+00> : vector<16xf32>
    %67 = vector.multi_reduction <add>, %66, %cst_31 [0] : vector<16x16xf32> to vector<16xf32>
    %68 = vector.shape_cast %67 : vector<16xf32> to vector<1x16xf32>
    %c0_32 = arith.constant 0 : index
    %c0_33 = arith.constant 0 : index
    %c0_34 = arith.constant 0 : index
    %c0_35 = arith.constant 0 : index
    %69 = vector.load %arg9[%c0_32, %c0_33, %c0_34, %c0_35] : memref<1x1x2x16xf32, #tpu.memory_space<vmem>>, vector<1x1x1x16xf32>
    %70 = vector.shape_cast %69 : vector<1x1x1x16xf32> to vector<1x16xf32>
    %71 = vector.shape_cast %68 : vector<1x16xf32> to vector<1x1x1x16xf32>
    tpu.vector_store %arg9[%c0_32, %c0_33, %c0_34, %c0_35], %71 {strides = array<i32>} : memref<1x1x2x16xf32, #tpu.memory_space<vmem>>, vector<1x1x1x16xf32>,
    %72 = arith.mulf %66, %66 : vector<16x16xf32>
    %cst_36 = arith.constant dense<0.000000e+00> : vector<16xf32>
    %73 = vector.multi_reduction <add>, %72, %cst_36 [0] : vector<16x16xf32> to vector<16xf32>
    %74 = vector.shape_cast %73 : vector<16xf32> to vector<1x16xf32>
    %c0_37 = arith.constant 0 : index
    %c0_38 = arith.constant 0 : index
    %c1 = arith.constant 1 : index
    %c0_39 = arith.constant 0 : index
    %75 = vector.load %arg9[%c0_37, %c0_38, %c1, %c0_39] : memref<1x1x2x16xf32, #tpu.memory_space<vmem>>, vector<1x1x1x16xf32>
    %76 = vector.shape_cast %75 : vector<1x1x1x16xf32> to vector<1x16xf32>
    %77 = vector.shape_cast %74 : vector<1x16xf32> to vector<1x1x1x16xf32>
    tpu.vector_store %arg9[%c0_37, %c0_38, %c1, %c0_39], %77 {strides = array<i32>} : memref<1x1x2x16xf32, #tpu.memory_space<vmem>>, vector<1x1x1x16xf32>,
    %78 = arith.truncf %66 : vector<16x16xf32> to vector<16x16xbf16>
    %c0_40 = arith.constant 0 : index
    %c0_41 = arith.constant 0 : index
    %c0_42 = arith.constant 0 : index
    %c0_43 = arith.constant 0 : index
    %79 = vector.load %arg8[%c0_40, %c0_41, %c0_42, %c0_43] : memref<1x1x16x16xbf16, #tpu.memory_space<vmem>>, vector<1x1x16x16xbf16>
    %80 = vector.shape_cast %79 : vector<1x1x16x16xbf16> to vector<16x16xbf16>
    %81 = vector.shape_cast %78 : vector<16x16xbf16> to vector<1x1x16x16xbf16>
    tpu.vector_store %arg8[%c0_40, %c0_41, %c0_42, %c0_43], %81 {strides = array<i32>} : memref<1x1x16x16xbf16, #tpu.memory_space<vmem>>, vector<1x1x16x16xbf16>,
    return
  }
  func.func @transform_0(%arg0: i32, %arg1: i32) -> (i32, i32, i32, i32) {
    %c1_i32 = arith.constant 1 : i32
    %0 = arith.subi %arg1, %c1_i32 : i32
    %c0_i32 = arith.constant 0 : i32
    %1 = arith.maxsi %0, %c0_i32 : i32
    %c0_i32_0 = arith.constant 0 : i32
    %c0_i32_1 = arith.constant 0 : i32
    %c0_i32_2 = arith.constant 0 : i32
    return %arg0, %1, %c0_i32_0, %c0_i32_1 : i32, i32, i32, i32
  }
  func.func @transform_1(%arg0: i32, %arg1: i32) -> (i32, i32, i32, i32) {
    %c0_i32 = arith.constant 0 : i32
    %c0_i32_0 = arith.constant 0 : i32
    %c0_i32_1 = arith.constant 0 : i32
    return %arg0, %arg1, %c0_i32, %c0_i32_0 : i32, i32, i32, i32
  }
  func.func @transform_2(%arg0: i32, %arg1: i32) -> (i32, i32, i32, i32) {
    %c1_i32 = arith.constant 1 : i32
    %0 = arith.addi %arg1, %c1_i32 : i32
    %c31_i32 = arith.constant 31 : i32
    %1 = arith.minsi %0, %c31_i32 : i32
    %c0_i32 = arith.constant 0 : i32
    %c0_i32_0 = arith.constant 0 : i32
    %c0_i32_1 = arith.constant 0 : i32
    return %arg0, %1, %c0_i32, %c0_i32_0 : i32, i32, i32, i32
  }
  func.func @transform_3(%arg0: i32, %arg1: i32) -> (i32, i32) {
    %c0_i32 = arith.constant 0 : i32
    %c0_i32_0 = arith.constant 0 : i32
    %c0_i32_1 = arith.constant 0 : i32
    return %c0_i32, %c0_i32_0 : i32, i32
  }
  func.func @transform_4(%arg0: i32, %arg1: i32) -> (i32, i32) {
    %c0_i32 = arith.constant 0 : i32
    %c0_i32_0 = arith.constant 0 : i32
    %c0_i32_1 = arith.constant 0 : i32
    return %c0_i32, %c0_i32_0 : i32, i32
  }
  func.func @transform_5(%arg0: i32, %arg1: i32) -> (i32, i32) {
    %c0_i32 = arith.constant 0 : i32
    %c0_i32_0 = arith.constant 0 : i32
    %c0_i32_1 = arith.constant 0 : i32
    return %c0_i32, %c0_i32_0 : i32, i32
  }
  func.func @transform_6(%arg0: i32, %arg1: i32) -> (i32, i32, i32, i32) {
    %c0_i32 = arith.constant 0 : i32
    %c0_i32_0 = arith.constant 0 : i32
    %c0_i32_1 = arith.constant 0 : i32
    return %arg0, %arg1, %c0_i32, %c0_i32_0 : i32, i32, i32, i32
  }
  func.func @transform_7(%arg0: i32, %arg1: i32) -> (i32, i32, i32, i32) {
    %c0_i32 = arith.constant 0 : i32
    %c0_i32_0 = arith.constant 0 : i32
    %c0_i32_1 = arith.constant 0 : i32
    return %arg0, %arg1, %c0_i32, %c0_i32_0 : i32, i32, i32, i32
  }
}

module attributes {stable_mosaic.version = 11 : i64} {
  func.func @_affine_relu_kernel(%arg0: i32, %arg1: memref<64x256xbf16, #tpu.memory_space<vmem>>, %arg2: memref<1x256xf32, #tpu.memory_space<vmem>>, %arg3: memref<1x256xf32, #tpu.memory_space<vmem>>, %arg4: memref<64x256xbf16, #tpu.memory_space<vmem>>) attributes {dimension_semantics = [#tpu.dimension_semantics<parallel>], iteration_bounds = array<i64: 1>, scalar_prefetch = 0 : i64, scratch_operands = 0 : i64, tpu.core_type = #tpu.core_type<tc>, window_params = [{transform_indices = @transform_0, window_bounds = array<i64: 64, 256>}, {pipeline_mode = #tpu.pipeline_mode<synchronous>, transform_indices = @transform_1, window_bounds = array<i64: 1, 256>}, {pipeline_mode = #tpu.pipeline_mode<synchronous>, transform_indices = @transform_2, window_bounds = array<i64: 1, 256>}, {transform_indices = @transform_3, window_bounds = array<i64: 64, 256>}]} {
    %c0 = arith.constant 0 : index
    %c0_0 = arith.constant 0 : index
    %0 = vector.load %arg1[%c0, %c0_0] : memref<64x256xbf16, #tpu.memory_space<vmem>>, vector<64x256xbf16>
    %1 = arith.extf %0 : vector<64x256xbf16> to vector<64x256xf32>
    %c0_1 = arith.constant 0 : index
    %c0_2 = arith.constant 0 : index
    %2 = vector.load %arg2[%c0_1, %c0_2] : memref<1x256xf32, #tpu.memory_space<vmem>>, vector<1x256xf32>
    %3 = vector.broadcast %2 : vector<1x256xf32> to vector<64x256xf32>
    %4 = arith.mulf %1, %3 : vector<64x256xf32>
    %c0_3 = arith.constant 0 : index
    %c0_4 = arith.constant 0 : index
    %5 = vector.load %arg3[%c0_3, %c0_4] : memref<1x256xf32, #tpu.memory_space<vmem>>, vector<1x256xf32>
    %6 = vector.broadcast %5 : vector<1x256xf32> to vector<64x256xf32>
    %7 = arith.addf %4, %6 : vector<64x256xf32>
    %cst = arith.constant 0.000000e+00 : f32
    %8 = vector.broadcast %cst : f32 to vector<64x256xf32>
    %9 = arith.maximumf %7, %8 : vector<64x256xf32>
    %10 = arith.truncf %9 : vector<64x256xf32> to vector<64x256xbf16>
    %c0_5 = arith.constant 0 : index
    %c0_6 = arith.constant 0 : index
    %11 = vector.load %arg4[%c0_5, %c0_6] : memref<64x256xbf16, #tpu.memory_space<vmem>>, vector<64x256xbf16>
    tpu.vector_store %arg4[%c0_5, %c0_6], %10 {strides = array<i32>} : memref<64x256xbf16, #tpu.memory_space<vmem>>, vector<64x256xbf16>,
    return
  }
  func.func @transform_0(%arg0: i32) -> (i32, i32) {
    %c0_i32 = arith.constant 0 : i32
    %c0_i32_0 = arith.constant 0 : i32
    return %arg0, %c0_i32 : i32, i32
  }
  func.func @transform_1(%arg0: i32) -> (i32, i32) {
    %c0_i32 = arith.constant 0 : i32
    %c0_i32_0 = arith.constant 0 : i32
    %c0_i32_1 = arith.constant 0 : i32
    return %c0_i32, %c0_i32_0 : i32, i32
  }
  func.func @transform_2(%arg0: i32) -> (i32, i32) {
    %c0_i32 = arith.constant 0 : i32
    %c0_i32_0 = arith.constant 0 : i32
    %c0_i32_1 = arith.constant 0 : i32
    return %c0_i32, %c0_i32_0 : i32, i32
  }
  func.func @transform_3(%arg0: i32) -> (i32, i32) {
    %c0_i32 = arith.constant 0 : i32
    %c0_i32_0 = arith.constant 0 : i32
    return %arg0, %c0_i32 : i32, i32
  }
}

</mosaic_0001>

<bundles_post_ra>
// kernel: squeeze.4
= control target key start
LH: loop header
LB: loop body
LE: loop exit
PB: predicated region body
PF: predicated region fallthrough
CT: control target
= control target key end

     0   :  { %s37_s8 = smov 80   ;;  %s38_s9 = smov 96   ;;  %vm7_vm0 = vcmask 130048   ;;  %s55_s0 = inlined_call_operand.vmem [shape: f32[64], index: 0, kind: input, shape index: {}]   ;;  %s56_s1 = inlined_call_operand.vmem [shape: f32[4,16], index: 1, kind: output, shape index: {}]  }
   0x1   :  { %v4_v0 = vld [vmem:[%s55_s0] sm:$0x1]  ;;  %s36_s0 = smov 112  }
   0x2   :  { %5 = vst [vmem:[#allocation1] sm:$0x1] %v4_v0 }
   0x9   :  { %v9_v1 = vld [vmem:[#allocation1] sm:$0x1]  }
   0xa   :  { %v21_v2 = vld [vmem:[#allocation1] sm:$0x1]   ;;  %10 = vrot.lane.b32.xlu0 %v9_v1, %s36_s0 }
   0xb   :  { %22 = vrot.lane.b32.xlu1 %v21_v2, %s37_s8  ;;  %v15_v3 = vld [vmem:[#allocation1] sm:$0x1]  }
   0xc   :  { %v6_v4 = vld [vmem:[#allocation1] sm:$0x1]  }
   0xd   :  { %8 = vst.msk [vmem:[#allocation0] sm:$0x1] %vm7_vm0, %v6_v4  }
  0x12   :  { %16 = vrot.lane.b32.xlu0 %v15_v3, %s38_s9 }
  0x7c   :  { %v11_v5 = vpop.permute.xlu0 %10  }
  0x7d   :  { %v23_v6 = vpop.permute.xlu1 %22   ;;  %14 = vst.msk [vmem:[#allocation0 + $0x1] sm:$0x1] %vm7_vm0, %v11_v5  }
  0x7e   :  { %26 = vst.msk [vmem:[#allocation0 + $0x3] sm:$0x1] %vm7_vm0, %v23_v6  }
  0x84   :  { %v17_v7 = vpop.permute.xlu0 %16  }
  0x85   :  { %20 = vst.msk [vmem:[#allocation0 + $0x2] sm:$0x1] %vm7_vm0, %v17_v7  }
  0x8c   :  { %v29_v8 = vld [vmem:[#allocation0] sm:$0xf] }
  0x8d   :  { %32 = vst [vmem:[%s56_s1] sm:$0xf] %v29_v8 }

// kernel: tile.28
= control target key start
LH: loop header
LB: loop body
LE: loop exit
PB: predicated region body
PF: predicated region fallthrough
CT: control target
= control target key end

     0   :  { %s22_s0 = inlined_call_operand.vmem [shape: f32[16], index: 0, kind: input, shape index: {}]   ;;  %s23_s1 = inlined_call_operand.vmem [shape: f32[2,16], index: 1, kind: output, shape index: {}]  }
   0x1   :  { %v4_v0 = vld [vmem:[%s22_s0] ss:$0 sm:$0xff] }
   0x2   :  { %5 = vst [vmem:[%s23_s1] sm:$0x3] %v4_v0 }

// kernel: tile.29
= control target key start
LH: loop header
LB: loop body
LE: loop exit
PB: predicated region body
PF: predicated region fallthrough
CT: control target
= control target key end

     0   :  { %vm7_vm0 = vcmask 130048   ;;  %vm13_vm1 = vcmask 261248   ;;  %s39_s0 = inlined_call_operand.vmem [shape: f32[2,16], index: 0, kind: input, shape index: {}]   ;;  %s40_s1 = inlined_call_operand.vmem [shape: f32[1,32], index: 1, kind: output, shape index: {}]  }
   0x1   :  { %v4_v0 = vld [vmem:[%s39_s0] sm:$0x3]  ;;  %s22_s0 = smov 16  }
   0x2   :  { %5 = vst [vmem:[#allocation1] sm:$0x3] %v4_v0 }
   0x9   :  { %v10_v1 = vld [vmem:[#allocation1 + $0x1] sm:$0x1]   ;;  %v6_v2 = vld [vmem:[#allocation1] sm:$0x1]  }
   0xa   :  { %11 = vrot.lane.b32.xlu0 %v10_v1, %s22_s0  ;;  %8 = vst.msk [vmem:[#allocation0] sm:$0x1] %vm7_vm0, %v6_v2  }
  0x7c   :  { %v12_v3 = vpop.permute.xlu0 %11  }
  0x7d   :  { %14 = vst.msk [vmem:[#allocation0] sm:$0x1] %vm13_vm1, %v12_v3  }
  0x84   :  { %v17_v4 = vld [vmem:[#allocation0] sm:$0x1] }
  0x85   :  { %20 = vst [vmem:[%s40_s1] sm:$0x1] %v17_v4 }

// kernel: squeeze.6
= control target key start
LH: loop header
LB: loop body
LE: loop exit
PB: predicated region body
PF: predicated region fallthrough
CT: control target
= control target key end

     0   :  { %vm7_vm0 = vcmask 64512   ;;  %s39_s0 = inlined_call_operand.vmem [shape: f32[16], index: 0, kind: input, shape index: {}]   ;;  %s40_s1 = inlined_call_operand.vmem [shape: f32[2,8], index: 1, kind: output, shape index: {}]  }
   0x1   :  { %v4_v0 = vld [vmem:[%s39_s0] sm:$0x1]  ;;  %s22_s0 = smov 120  }
   0x2   :  { %5 = vst [vmem:[#allocation1] sm:$0x1] %v4_v0 }
   0x9   :  { %v9_v1 = vld [vmem:[#allocation1] sm:$0x1]  }
   0xa   :  { %v6_v2 = vld [vmem:[#allocation1] sm:$0x1]   ;;  %10 = vrot.lane.b32.xlu0 %v9_v1, %s22_s0 }
   0xb   :  { %8 = vst.msk [vmem:[#allocation0] sm:$0x1] %vm7_vm0, %v6_v2  }
  0x7c   :  { %v11_v3 = vpop.permute.xlu0 %10  }
  0x7d   :  { %14 = vst.msk [vmem:[#allocation0 + $0x1] sm:$0x1] %vm7_vm0, %v11_v3  }
  0x84   :  { %v17_v4 = vld [vmem:[#allocation0] sm:$0x3] }
  0x85   :  { %20 = vst [vmem:[%s40_s1] sm:$0x3] %v17_v4 }

// kernel: tile.38
= control target key start
LH: loop header
LB: loop body
LE: loop exit
PB: predicated region body
PF: predicated region fallthrough
CT: control target
= control target key end

     0   :  { %s40_s0 = inlined_call_operand.vmem [shape: f32[8], index: 0, kind: input, shape index: {}]   ;;  %s41_s1 = inlined_call_operand.vmem [shape: f32[32,8], index: 1, kind: output, shape index: {}]  }
   0x1   :  { %v4_v0 = vld [vmem:[%s40_s0] ss:$0 sm:$0xff] }
   0x2   :  { %5 = vst [vmem:[%s41_s1] sm:$0xff] %v4_v0 }
   0x3   :  { %12 = vst [vmem:[%s41_s1 + $0x8] sm:$0xff] %v4_v0 }
   0x4   :  { %13 = vst [vmem:[%s41_s1 + $0x10] sm:$0xff] %v4_v0 }
   0x5   :  { %14 = vst [vmem:[%s41_s1 + $0x18] sm:$0xff] %v4_v0 }

// kernel: tile.39
= control target key start
LH: loop header
LB: loop body
LE: loop exit
PB: predicated region body
PF: predicated region fallthrough
CT: control target
= control target key end

     0   :  { %s7_s6 = smov 3  ;;  %s21_s9 = smov 3  ;;  %vm4_vm0 = vcmask 64512   ;;  %vm11_vm1 = vcmask 1048512   ;;  %vm18_vm2 = vcmask 982912   ;;  %vm25_vm3 = vcmask 917312   ;;  %s233_s0 = inlined_call_operand.vmem [shape: f32[32,8], index: 0, kind: input, shape index: {}]   ;;  %s234_s1 = inlined_call_operand.vmem [shape: f32[1,256], index: 1, kind: output, shape index: {}]  }
   0x1   :  { %v123_v0 = vld [vmem:[%s233_s0 + $0xf] ss:$16 sm:%s7_s6]   ;;  %s154_s10 = smov 120   ;;  %v125_v1 = vld [vmem:[%s233_s0 + $0xd] ss:$16 sm:%s21_s9]   ;;  %s155_s13 = smov 104  }
   0x2   :  { %9 = vrot.lane.b32.xlu0 %v123_v0, %s154_s10  ;;  %23 = vrot.lane.b32.xlu1 %v125_v1, %s155_s13  ;;  %s14_s14 = smov 3  ;;  %s28_s15 = smov 3  ;;  %vm32_vm4 = vcmask 851712   ;;  %vm39_vm5 = vcmask 786112   ;;  %vm46_vm6 = vcmask 720512   ;;  %vm53_vm7 = vcmask 654912  }
   0x3   :  { %v124_v2 = vld [vmem:[%s233_s0 + $0xe] ss:$16 sm:%s14_s14]   ;;  %v126_v3 = vld [vmem:[%s233_s0 + $0xc] ss:$16 sm:%s28_s15]   ;;  %s35_s20 = smov 3  ;;  %s156_s23 = smov 112  }
   0x4   :  { %v127_v4 = vld [vmem:[%s233_s0 + $0xb] ss:$16 sm:%s35_s20]   ;;  %s157_s24 = smov 88   ;;  %s158_s25 = smov 96   ;;  %vm60_vm8 = vcmask 589312   ;;  %vm67_vm9 = vcmask 523712  }
   0x5   :  { %37 = vrot.lane.b32.xlu2 %v127_v4, %s157_s24  ;;  %s49_s26 = smov 3  ;;  %s42_s27 = smov 3  ;;  %vm74_vm10 = vcmask 458112   ;;  %vm81_vm11 = vcmask 392512   ;;  %vm88_vm12 = vcmask 326912   ;;  %vm95_vm13 = vcmask 261312  }
   0x6   :  { %s56_s28 = smov 3  ;;  %v129_v5 = vld [vmem:[%s233_s0 + $0x9] ss:$16 sm:%s49_s26]   ;;  %v128_v6 = vld [vmem:[%s233_s0 + $0xa] ss:$16 sm:%s42_s27]   ;;  %s159_s6 = smov 72  }
   0x7   :  { %v130_v7 = vld [vmem:[%s233_s0 + $0x8] ss:$16 sm:%s56_s28]   ;;  %s160_s7 = smov 80   ;;  %s161_s8 = smov 64   ;;  %vm102_vm14 = vcmask 195712   ;;  %vm109_vm15 = vcmask 130112  }
   0x8   :  { %s70_s9 = smov 3  ;;  %s63_s10 = smov 3 }
   0x9   :  { %s77_s11 = smov 3  ;;  %v132_v8 = vld [vmem:[%s233_s0 + $0x6] ss:$16 sm:%s70_s9]   ;;  %v131_v9 = vld [vmem:[%s233_s0 + $0x7] ss:$16 sm:%s63_s10]   ;;  %s162_s18 = smov 48  }
   0xa   :  { %16 = vrot.lane.b32.xlu0 %v124_v2, %s156_s23  ;;  %30 = vrot.lane.b32.xlu1 %v126_v3, %s158_s25  ;;  %v133_v10 = vld [vmem:[%s233_s0 + $0x5] ss:$16 sm:%s77_s11]   ;;  %s163_s19 = smov 56   ;;  %s164_s20 = smov 40  }
   0xb   :  { %s91_s21 = smov 3  ;;  %s84_s22 = smov 3 }
   0xc   :  { %s98_s23 = smov 3  ;;  %v135_v11 = vld [vmem:[%s233_s0 + $0x3] ss:$16 sm:%s91_s21]   ;;  %v134_v12 = vld [vmem:[%s233_s0 + $0x4] ss:$16 sm:%s84_s22]   ;;  %s165_s30 = smov 24  }
   0xd   :  { %44 = vrot.lane.b32.xlu2 %v128_v6, %s160_s7  ;;  %v136_v13 = vld [vmem:[%s233_s0 + $0x2] ss:$16 sm:%s98_s23]   ;;  %s166_s2 = smov 32   ;;  %s167_s3 = smov 16  }
   0xe   :  { %s105_s4 = smov 3  ;;  %s168_s7 = smov 8  }
   0xf   :  { %v137_v14 = vld [vmem:[%s233_s0 + $0x1] ss:$16 sm:%s105_s4]  }
  0x12   :  { %51 = vrot.lane.b32.xlu0 %v129_v5, %s159_s6  ;;  %58 = vrot.lane.b32.xlu1 %v130_v7, %s161_s8  ;;  %s2_s8 = smov 3 }
  0x13   :  { %v3_v15 = vld [vmem:[%s233_s0] ss:$16 sm:%s2_s8]  }
  0x14   :  { %5 = vst.msk [vmem:[#allocation0] ss:$8 sm:$0x3] %vm4_vm0, %v3_v15  }
  0x15   :  { %65 = vrot.lane.b32.xlu2 %v131_v9, %s163_s19 }
  0x1a   :  { %72 = vrot.lane.b32.xlu0 %v132_v8, %s162_s18  ;;  %79 = vrot.lane.b32.xlu1 %v133_v10, %s164_s20 }
  0x1d   :  { %86 = vrot.lane.b32.xlu2 %v134_v12, %s166_s2 }
  0x22   :  { %93 = vrot.lane.b32.xlu0 %v135_v11, %s165_s30  ;;  %100 = vrot.lane.b32.xlu1 %v136_v13, %s167_s3 }
  0x25   :  { %107 = vrot.lane.b32.xlu2 %v137_v14, %s168_s7 }
  0x5f   :  { %v38_v16 = vpop.permute.xlu2 %37  }
  0x67   :  { %v45_v17 = vpop.permute.xlu2 %44  }
  0x6f   :  { %v66_v19 = vpop.permute.xlu2 %65  }
  0x74   :  { %v10_v18 = vpop.permute.xlu0 %9   ;;  %v24_v20 = vpop.permute.xlu1 %23  }
  0x75   :  { %12 = vst.msk [vmem:[#allocation0] ss:$8 sm:$0x3] %vm11_vm1, %v10_v18  }
  0x77   :  { %v87_v22 = vpop.permute.xlu2 %86  }
  0x7c   :  { %v17_v21 = vpop.permute.xlu0 %16   ;;  %v31_v23 = vpop.permute.xlu1 %30  }
  0x7d   :  { %19 = vst.msk [vmem:[#allocation0] ss:$8 sm:$0x3] %vm18_vm2, %v17_v21  }
  0x7e   :  { %26 = vst.msk [vmem:[#allocation0] ss:$8 sm:$0x3] %vm25_vm3, %v24_v20  }
  0x7f   :  { %33 = vst.msk [vmem:[#allocation0] ss:$8 sm:$0x3] %vm32_vm4, %v31_v23   ;;  %v108_v25 = vpop.permute.xlu2 %107  }
  0x80   :  { %40 = vst.msk [vmem:[#allocation0] ss:$8 sm:$0x3] %vm39_vm5, %v38_v16  }
  0x81   :  { %47 = vst.msk [vmem:[#allocation0] ss:$8 sm:$0x3] %vm46_vm6, %v45_v17  }
  0x84   :  { %v52_v24 = vpop.permute.xlu0 %51   ;;  %v59_v26 = vpop.permute.xlu1 %58  }
  0x85   :  { %54 = vst.msk [vmem:[#allocation0] ss:$8 sm:$0x3] %vm53_vm7, %v52_v24  }
  0x86   :  { %61 = vst.msk [vmem:[#allocation0] ss:$8 sm:$0x3] %vm60_vm8, %v59_v26  }
  0x87   :  { %68 = vst.msk [vmem:[#allocation0] ss:$8 sm:$0x3] %vm67_vm9, %v66_v19  }
  0x8c   :  { %v73_v27 = vpop.permute.xlu0 %72   ;;  %v80_v28 = vpop.permute.xlu1 %79  }
  0x8d   :  { %75 = vst.msk [vmem:[#allocation0] ss:$8 sm:$0x3] %vm74_vm10, %v73_v27  }
  0x8e   :  { %82 = vst.msk [vmem:[#allocation0] ss:$8 sm:$0x3] %vm81_vm11, %v80_v28  }
  0x8f   :  { %89 = vst.msk [vmem:[#allocation0] ss:$8 sm:$0x3] %vm88_vm12, %v87_v22  }
  0x94   :  { %v94_v29 = vpop.permute.xlu0 %93   ;;  %v101_v30 = vpop.permute.xlu1 %100  }
  0x95   :  { %96 = vst.msk [vmem:[#allocation0] ss:$8 sm:$0x3] %vm95_vm13, %v94_v29  }
  0x96   :  { %103 = vst.msk [vmem:[#allocation0] ss:$8 sm:$0x3] %vm102_vm14, %v101_v30  }
  0x97   :  { %110 = vst.msk [vmem:[#allocation0] ss:$8 sm:$0x3] %vm109_vm15, %v108_v25  }
  0x9e   :  { %v113_v31 = vld [vmem:[#allocation0] sm:$0x1]  ;;  %v118_v32 = vld [vmem:[#allocation0 + $0x8] sm:$0x1] }
  0x9f   :  { %116 = vst [vmem:[%s234_s1] sm:$0x1] %v113_v31 }
  0xa0   :  { %138 = vst [vmem:[%s234_s1 + $0x1] sm:$0x1] %v118_v32 }

// kernel: upsampling_block_forward.3
= control target key start
LH: loop header
LB: loop body
LE: loop exit
PB: predicated region body
PF: predicated region fallthrough
CT: control target
= control target key end

     0   :  { %s1068_s18 = smov 0   ;;  %s1070_s19 = smov 0   ;;  %s1230_s0 = inlined_call_operand.vmem [shape: bf16[2,16,16,8], index: 0, kind: input, shape index: {}, may-alias: {0,1,2}]   ;;  %s1231_s1 = inlined_call_operand.vmem [shape: bf16[2,16,16,8], index: 1, kind: input, shape index: {}, may-alias: {0,1,2}]   ;;  %s1232_s2 = inlined_call_operand.vmem [shape: bf16[2,16,16,8], index: 2, kind: input, shape index: {}, may-alias: {0,1,2}]   ;;  %s1233_s3 = inlined_call_operand.vmem [shape: bf16[72,64], index: 3, kind: input, shape index: {}]   ;;  %s1234_s4 = inlined_call_operand.vmem [shape: bf16[2,32,16,32], index: 4, kind: output, shape index: {0}]   ;;  %s1235_s5 = inlined_call_operand.vmem [shape: f32[2,16,2,64], index: 5, kind: output, shape index: {1}]  }
   0x1   :  { %1238 = sst [smem:[#allocation2_spill]] %s1231_s1  ;;  %s1072_s20 = smov 0  }
   0x2   :  { %s1074_s21 = smov 0   ;;  %s1076_s22 = smov 0  }
   0x3 LB: > { %s25_s23 = sadd.s32 1, %s1023_s20  ;;  %s28_s24 = sadd.s32 1, %s1027_s21  ;;  %s1031_s22 = sphi %s1076_s22, %s16_s22   ;;  %s1027_s21 = sphi %s1074_s21, %s1248_s21   ;;  %s1023_s20 = sphi %s1072_s20, %s1247_s20   ;;  %s1019_s19 = sphi %s1070_s19, %s1246_s19   ;;  %s1015_s18 = sphi %s1068_s18, %s1245_s18  }
   0x4   : > { %p26_p0 = scmp.ge.s32.totalorder %s25_s23, 16  ;;  %p883_p1 = scmp.ge.s32.totalorder %s1031_s22, 1 }
   0x5   : > { %p268_p2 = scmp.lt.s32.totalorder %s1031_s22, 33 }
   0x6   : > { %s1250_s23 = smov (%p26_p0, %s25_s23), 0  ;;  %s1252_s24 = smov (!%p26_p0, %s28_s24), %s1027_s21 }
   0x7   : > { %p269_p3 = pnand %p883_p1, %p268_p2  ;;  %p30_p4 = scmp.ge.s32.totalorder %s1252_s24, 2 }
   0x8   : > { %p340_p5 = scmp.lt.s32.totalorder (!%p269_p3), %s1019_s19, 1  ;;  %p354_p6 = scmp.lt.s32.totalorder (!%p269_p3), %s1015_s18, 15 }
   0x9   : > { %s1254_s24 = smov (%p30_p4, %s1252_s24), 0  ;;  %272 = sbr.rel (%p269_p3) target bundleno = 551 (0x227), region = 36 }
   0xa   : > { %s361_s25 = sadd.s32 (!%p269_p3), 1, %s1015_s18  ;;  %p515_p8 = scmp.le.s32.totalorder (!%p269_p3), %s1015_s18, 14 }
   0xb   : > { %p1111_p7 = scmp.lt.s32.totalorder (!%p269_p3), %s361_s25, 15  ;;  %s1240_s1 = sld [smem:[#allocation2_spill]] (!%p269_p3) }
   0xc   : > { %p398_p10 = scmp.ge.s32.totalorder (!%p269_p3), %s1015_s18, 1 }
   0xe   : > { %s1256_s19 = smov (!%p340_p5, %s1019_s19), 1  ;;  %s1258_s25 = smov (!%p1111_p7, %s361_s25), 15  ;;  %vm436_vm0 = vcmask 1040384   ;;  %vm437_vm1 = vsmask.f32 256  ;;  %vm458_vm4 = vcmask 1046528  }
   0xf   : > { %s1105_s26 = scalar_select %p354_p6, %s1015_s18, 15  ;;  %vm1124_vm2 = vmand %vm436_vm0, %vm437_vm1  ;;  %vm441_vm3 = vsmask.f32 7424  ;;  %vm464_vm5 = vcmask 64512   ;;  %vm631_vm6 = vcmask 1043456   ;;  %vm467_vm7 = vcmask 130048  }
  0x10   : > { %s1108_s27 = sshll.u32 %s1256_s19, 5  ;;  %s1260_s25 = smov (!%p1111_p7, %s1258_s25), 15  ;;  %vm586_vm8 = vcmask 195584   ;;  %vm589_vm9 = vcmask 392192   ;;  %vm628_vm10 = vcmask 588800   ;;  %vm675_vm11 = vcmask 257024  }
  0x11   : > { %s893_s28 = sshll.u32 %s1105_s26, 1  ;;  %s899_s12 = sshll.u32 %s1260_s25, 1  ;;  %vm649_vm12 = vcmask 523264   ;;  %vm659_vm13 = vcmask 516096  }
  0x12   : > { %s358_s30 = sadd.s32 %s893_s28, %s1108_s27  ;;  %s370_s13 = sadd.s32 %s899_s12, %s1108_s27 }
  0x13   : > { %s895_s6 = sshll.u32 %s358_s30, 2  ;;  %s901_s14 = sshll.u32 %s370_s13, 2 }
  0x14   : > { %s360_s9 = scalar_lea.vmem %s1240_s1, %s895_s6  ;;  %s372_s29 = scalar_lea.vmem %s1232_s2, %s901_s14 }
  0x15   : > { %v935_v0 = vld [vmem:[%s360_s9] sm:$0xff]  ;;  %s516_s10 = scalar_select %p515_p8, 1, 0 }
  0x16   : > { %v478_v1 = vshrl.u32 %v935_v0, 16  ;;  %v481_v2 = vshll.u32 %v935_v0, 16  ;;  %v945_v13 = vld [vmem:[%s372_s29] sm:$0xff]   ;;  %s399_s12 = scalar_select %p398_p10, 1, 0 }
  0x17   : > { %s517_s11 = scvt.s32.f32 %s516_s10  ;;  %v946_v16 = vunpack.c.l.bf16 %v945_v13  ;;  %v947_v17 = vunpack.c.h.bf16 %v945_v13  ;;  %s1237_s10 = smov 8  }
  0x18   : > { %v480_v3 = vrot.slane %v478_v1, 7  ;;  %s400_s13 = scvt.s32.f32 %s399_s12  ;;  %s884_s14 = sadd.s32 4294967295, %s1015_s18 }
  0x19   : > { %s520_s15 = sshrl.u32 %s517_s11, 16  ;;  %p519_p9 = scmp.ne.f32.partialorder %s517_s11, %s517_s11 }
  0x1a   : > { %v483_v5 = vor.u32 %v481_v2, %v480_v3  ;;  %v487_v6 = vsel %vm1124_vm2, %v480_v3, 0  ;;  %s521_s16 = sand.u32 1, %s520_s15  ;;  %s403_s15 = sshrl.u32 %s400_s13, 16  ;;  %v600_v3 = vld [vmem:[%s1233_s3 + $0x20] sm:$0xf] }
  0x1b   : > { %v496_v7 = vshll.u32 %v487_v6, 16  ;;  %s522_s17 = sadd.s32 32767, %s521_s16  ;;  %v505_v21 = vrot.slane %v487_v6, 1  ;;  %p338_p11 = scmp.gt.s32.totalorder %s884_s14, 0  ;;  %v618_v6 = vunpack.c.l.b16 %v600_v3 }
  0x1c   : > { %v1133_v8 = vsel %vm1124_vm2, 0, %v483_v5  ;;  %s523_s30 = sadd.s32 %s522_s17, %s517_s11  ;;  %s1236_s11 = smov 16  }
  0x1d   : > { %v489_v9 = vshrl.u32 %v1133_v8, 16  ;;  %v491_v10 = vshll.u32 %v1133_v8, 16  ;;  %s524_s6 = sand.u32 4294901760, %s523_s30  ;;  %v498_v12 = vrot.slane %v496_v7, 1  ;;  %v504_v20 = vrot.slane %v1133_v8, 1  ;;  %s404_s16 = sand.u32 1, %s403_s15 }
  0x1e   : > { %s1262_s6 = smov (%p519_p9, %s524_s6), 2143289344  ;;  %p885_p12 = scmp.lt.s32.totalorder %s884_s14, 15 }
  0x1f   : > { %v493_v11 = vrot.slane %v491_v10, 1  ;;  %s527_s7 = sshrl.u32 %s1262_s6, 16  ;;  %v506_v26 = vsel %vm458_vm4, %v504_v20, %v505_v21  ;;  %s405_s25 = sadd.s32 32767, %s404_s16 }
  0x20   : > { %s528_s8 = sshll.u32 %s527_s7, 16  ;;  %s406_s28 = sadd.s32 %s405_s25, %s400_s13 }
  0x21   : > { %v494_v14 = vor.u32 %v493_v11, %v489_v9  ;;  %s529_s9 = sor.u32 %s528_s8, %s527_s7  ;;  %p402_p13 = scmp.ne.f32.partialorder %s400_s13, %s400_s13  ;;  %v623_v11 = vpack.c.b16 %v618_v6, %v618_v6 }
  0x22   : > { %v530_v18 = vstv %s529_s9  ;;  %s339_s17 = scalar_select %p338_p11, %s884_s14, 0 }
  0x23   : > { %v499_v15 = vsel %vm441_vm3, %v494_v14, %v498_v12  ;;  %v534_v19 = vunpack.c.l.bf16 %v530_v18  ;;  %s407_s29 = sand.u32 4294901760, %s406_s28  ;;  %v633_v4 = vsel %vm631_vm6, %v623_v11, 0  ;;  %s1244_s13 = smov 16  }
  0x24   : > { %500 = vrot.lane.b32.xlu0 %v499_v15, %s1237_s10  ;;  %s1264_s17 = smov (!%p885_p12, %s339_s17), 15  ;;  %s1266_s29 = smov (%p402_p13, %s407_s29), 2143289344  ;;  %638 = vmatpush.bf16.msra.mxu0 %v633_v4 }
  0x25   : > { %v535_v22 = vmul.f32 %v946_v16, %v534_v19  ;;  %v536_v23 = vmul.f32 %v947_v17, %v534_v19  ;;  %s890_s30 = sshll.u32 %s1264_s17, 1  ;;  %s410_s7 = sshrl.u32 %s1266_s29, 16 }
  0x26   : > { %s346_s6 = sadd.s32 %s1108_s27, %s890_s30  ;;  %s411_s9 = sshll.u32 %s410_s7, 16 }
  0x27   : > { %v537_v24 = vpack.c.bf16 %v535_v22, %v535_v22  ;;  %v538_v25 = vpack.c.bf16 %v536_v23, %v536_v23  ;;  %s892_s8 = sshll.u32 %s346_s6, 2  ;;  %s412_s1 = sor.u32 %s411_s9, %s410_s7  ;;  %v939_v22 = vld [vmem:[%s1233_s3 + $0x18] sm:$0xff]  ;;  %v938_v23 = vld [vmem:[%s1233_s3 + $0x10] sm:$0xff] }
  0x28   : > { %s348_s12 = scalar_lea.vmem %s1230_s0, %s892_s8  ;;  %v413_v47 = vstv %s412_s1  ;;  %s1036_s14 = smov 48   ;;  %639 = vmatpush.bf16.msra.mxu0 %v939_v22 }
  0x29   : > { %v541_v27 = vunpack.c.l.b16 %v537_v24  ;;  %v542_v28 = vunpack.c.l.b16 %v538_v25  ;;  %v941_v46 = vld [vmem:[%s348_s12] sm:$0xff]   ;;  %v417_v50 = vunpack.c.l.bf16 %v413_v47  ;;  %v937_v24 = vld [vmem:[%s1233_s3 + $0x8] sm:$0xff]  ;;  %s902_s7 = sshll.u32 %s1015_s18, 1  ;;  %s904_s9 = sshll.u32 %s1256_s19, 6 }
  0x2a   : > { %v942_v48 = vunpack.c.l.bf16 %v941_v46  ;;  %v943_v49 = vunpack.c.h.bf16 %v941_v46  ;;  %v936_v25 = vld [vmem:[%s1233_s3] sm:$0xff]  ;;  %p379_p0 = scmp.lt.s32.totalorder %s902_s7, 31  ;;  %s906_s18 = sshll.u32 %s1256_s19, 4 }
  0x2b   : > { %v543_v29 = vpack.c.b16 %v542_v28, %v541_v27 }
  0x2c   : > { %507 = vrot.lane.b32.xlu0 %v506_v26, %s1236_s11  ;;  %v418_v51 = vmul.f32 %v942_v48, %v417_v50  ;;  %v419_v52 = vmul.f32 %v943_v49, %v417_v50  ;;  %640 = vmatpush.bf16.msra.mxu0 %v938_v23  ;;  %s1268_s7 = smov (!%p379_p0, %s902_s7), 31 }
  0x2d   : > { %v545_v30 = vshrl.u32 %v543_v29, 16  ;;  %v548_v31 = vshll.u32 %v543_v29, 16  ;;  %s903_s8 = sshll.u32 %s1268_s7, 1 }
  0x2e   : > { %v420_v53 = vpack.c.bf16 %v418_v51, %v418_v51  ;;  %v421_v54 = vpack.c.bf16 %v419_v52, %v419_v52  ;;  %s383_s12 = sadd.s32 %s904_s9, %s903_s8 }
  0x2f   : > { %v547_v32 = vrot.slane %v545_v30, 7  ;;  %s905_s1 = sshll.u32 %s383_s12, 2 }
  0x30   : > { %v424_v55 = vunpack.c.l.b16 %v420_v53  ;;  %v425_v56 = vunpack.c.l.b16 %v421_v54  ;;  %641 = vmatpush.bf16.msra.mxu0 %v937_v24 }
  0x31   : > { %v550_v33 = vor.u32 %v548_v31, %v547_v32  ;;  %v554_v34 = vsel %vm1124_vm2, %v547_v32, 0 }
  0x32   : > { %v563_v35 = vshll.u32 %v554_v34, 16  ;;  %v572_v44 = vrot.slane %v554_v34, 1  ;;  %v426_v57 = vpack.c.b16 %v425_v56, %v424_v55 }
  0x33   : > { %v1149_v36 = vsel %vm1124_vm2, 0, %v550_v33 }
  0x34   : > { %v556_v37 = vshrl.u32 %v1149_v36, 16  ;;  %v558_v38 = vshll.u32 %v1149_v36, 16  ;;  %v565_v40 = vrot.slane %v563_v35, 1  ;;  %v571_v43 = vrot.slane %v1149_v36, 1  ;;  %642 = vmatpush.bf16.msra.mxu0 %v936_v25 }
  0x35   : > { %v428_v58 = vshrl.u32 %v426_v57, 16  ;;  %v431_v60 = vshll.u32 %v426_v57, 16 }
  0x36   : > { %v560_v39 = vrot.slane %v558_v38, 1  ;;  %v573_v45 = vsel %vm458_vm4, %v571_v43, %v572_v44 }
  0x37   : > { %v430_v59 = vrot.slane %v428_v58, 7 }
  0x38   : > { %v561_v41 = vor.u32 %v560_v39, %v556_v37 }
  0x39   : > { %v433_v62 = vor.u32 %v431_v60, %v430_v59  ;;  %v440_v0 = vsel %vm1124_vm2, %v430_v59, 0 }
  0x3a   : > { %v566_v42 = vsel %vm441_vm3, %v561_v41, %v565_v40  ;;  %v450_v5 = vshll.u32 %v440_v0, 16  ;;  %v460_v17 = vrot.slane %v440_v0, 1 }
  0x3b   : > { %567 = vrot.lane.b32.xlu1 %v566_v42, %s1237_s10  ;;  %v439_v63 = vsel %vm1124_vm2, 0, %v433_v62  ;;  %s1035_s10 = smov 24  }
  0x3c   : > { %v443_v1 = vshrl.u32 %v439_v63, 16  ;;  %v445_v2 = vshll.u32 %v439_v63, 16  ;;  %v452_v10 = vrot.slane %v450_v5, 1  ;;  %v459_v16 = vrot.slane %v439_v63, 1 }
  0x3e   : > { %v447_v7 = vrot.slane %v445_v2, 1  ;;  %v461_v18 = vsel %vm458_vm4, %v459_v16, %v460_v17 }
  0x40   : > { %v448_v12 = vor.u32 %v447_v7, %v443_v1 }
  0x42   : > { %v453_v15 = vsel %vm441_vm3, %v448_v12, %v452_v10 }
  0x43   : > { %574 = vrot.lane.b32.xlu1 %v573_v45, %s1236_s11  ;;  %s1243_s11 = smov 8  }
  0x44   : > { %454 = vrot.lane.b32.xlu2 %v453_v15, %s1243_s11  ;;  %s1200_s11 = scalar_lea.vmem %s1234_s4, %s905_s1 }
  0x4c   : > { %462 = vrot.lane.b32.xlu2 %v461_v18, %s1244_s13  ;;  %s1037_s13 = smov 96  }
  0x96   : > { %v501_v61 = vpop.permute.xlu0 %500 }
  0x97   : > { %v510_v9 = vsel %vm464_vm5, %v1133_v8, %v501_v61 }
  0x9e   : > { %v508_v13 = vpop.permute.xlu0 %507  ;;  %v455_v26 = vpop.permute.xlu2 %454 }
  0x9f   : > { %v512_v14 = vsel %vm467_vm7, %v510_v9, %v508_v13  ;;  %v466_v27 = vsel %vm464_vm5, %v439_v63, %v455_v26 }
  0xa0   : > { %581 = vrot.lane.b32.xlu0 %v512_v14, %s1035_s10 }
  0xa6   : > { %v463_v28 = vpop.permute.xlu2 %462 }
  0xa7   : > { %v469_v29 = vsel %vm467_vm7, %v466_v27, %v463_v28 }
  0xad   : > { %v568_v8 = vpop.permute.xlu1 %567 }
  0xae   : > { %v577_v19 = vsel %vm464_vm5, %v1149_v36, %v568_v8 }
  0xb5   : > { %v575_v20 = vpop.permute.xlu1 %574 }
  0xb6   : > { %v579_v21 = vsel %vm467_vm7, %v577_v19, %v575_v20 }
  0xb7   : > { %584 = vrot.lane.b32.xlu1 %v579_v21, %s1036_s14  ;;  %s392_s14 = sadd.s32 %s906_s18, %s1105_s26 }
  0xb8   : > { %s907_s15 = sshll.u32 %s392_s14, 1 }
  0xb9   : > { %s394_s25 = scalar_lea.vmem %s1235_s5, %s907_s15 }
 0x112   : > { %v582_v30 = vpop.permute.xlu0 %581 }
 0x113   : > { %v588_v31 = vsel %vm586_vm8, %v469_v29, %v582_v30 }
 0x129   : > { %v585_v32 = vpop.permute.xlu1 %584 }
 0x12a   : > { %v591_v33 = vsel %vm589_vm9, %v588_v31, %v585_v32 }
 0x12b   : > { %928 = vmatmul.msk.bf16.vlgmr.msra.gmra.mxu0 %vm628_vm10, %v591_v33 }
 0x1a8   : > { %v644_v34 = vpop.f32.mrf.mxu0 }
 0x1a9   : > { %v673_v35 = vpack.c.bf16 %v644_v34, %v644_v34  ;;  %v661_v36 = vmul.f32 %v644_v34, %v644_v34  ;;  %v650_v38 = vsel %vm649_vm12, %v644_v34, 0.0 }
 0x1ab   : > { %680 = vrot.lane.b32.xlu2 %v673_v35, %s1037_s13  ;;  %676 = vst.msk [vmem:[%s1200_s11] sm:$0xf] %vm675_vm11, %v673_v35  ;;  %v663_v43 = vsel %vm649_vm12, %v661_v36, 0.0 }
 0x1b0   : > { %v646_v37 = vpop.f32.mrf.mxu0 }
 0x1b1   : > { %v651_v39 = vsel %vm649_vm12, %v646_v37, 0.0  ;;  %v662_v40 = vmul.f32 %v646_v37, %v646_v37  ;;  %v674_v41 = vpack.c.bf16 %v646_v37, %v646_v37 }
 0x1b2   : > { %v652_v42 = vadd.f32 %v651_v39, %v650_v38 }
 0x1b3   : > { %v664_v44 = vsel %vm649_vm12, %v662_v40, 0.0  ;;  %682 = vrot.lane.b32.xlu0 %v674_v41, %s1037_s13  ;;  %677 = vst.msk [vmem:[%s1200_s11 + $0x4] sm:$0xf] %vm675_vm11, %v674_v41 }
 0x1b4   : > { %v653_v45 = vrot.slane %v652_v42, 4  ;;  %v665_v46 = vadd.f32 %v664_v44, %v663_v43 }
 0x1b6   : > { %v654_v47 = vadd.f32 %v653_v45, %v652_v42  ;;  %v666_v48 = vrot.slane %v665_v46, 4 }
 0x1b8   : > { %v655_v49 = vrot.slane %v654_v47, 2  ;;  %v667_v50 = vadd.f32 %v666_v48, %v665_v46 }
 0x1ba   : > { %v656_v51 = vadd.f32 %v655_v49, %v654_v47  ;;  %v668_v52 = vrot.slane %v667_v50, 2 }
 0x1bc   : > { %v657_v53 = vrot.slane %v656_v51, 1  ;;  %v669_v54 = vadd.f32 %v668_v52, %v667_v50 }
 0x1be   : > { %v658_v55 = vadd.f32 %v657_v53, %v656_v51  ;;  %v670_v56 = vrot.slane %v669_v54, 1 }
 0x1c0   : > { %660 = vst.msk [vmem:[%s394_s25] sm:$0x1] %vm659_vm13, %v658_v55  ;;  %v671_v57 = vadd.f32 %v670_v56, %v669_v54 }
 0x1c2   : > { %672 = vst.msk [vmem:[%s394_s25 + $0x1] sm:$0x1] %vm659_vm13, %v671_v57 }
 0x205   : > { %v681_v58 = vpop.permute.xlu2 %680 }
 0x206   : > { %929 = vst.msk [vmem:[%s1200_s11 + $0x8] sm:$0xf] %vm675_vm11, %v681_v58 }
 0x225   : > { %v683_v59 = vpop.permute.xlu0 %682 }
 0x226   : > { %930 = vst.msk [vmem:[%s1200_s11 + $0xc] sm:$0xf] %vm675_vm11, %v683_v59 }
 0x227 PF: > { %s16_s22 = sadd.s32 1, %s1031_s22   ;;  %s1245_s18 = smov %s1023_s20 }
 0x228   : > { %p13_p1 = scmp.ge.s32.totalorder %s16_s22, 34   ;;  %s1246_s19 = smov %s1027_s21 }
 0x229   : > { %s1247_s20 = smov %s1250_s23  ;;  %s1248_s21 = smov %s1254_s24 }
 0x22a   :  { %15 = sbr.rel (!%p13_p1) target bundleno = 3 (0x3), region = 85 }

// kernel: upsampling_block_forward.5
= control target key start
LH: loop header
LB: loop body
LE: loop exit
PB: predicated region body
PF: predicated region fallthrough
CT: control target
= control target key end

     0   :  { %s232_s0 = inlined_call_operand.vmem [shape: bf16[64,256], index: 0, kind: input, shape index: {}]   ;;  %s233_s1 = inlined_call_operand.vmem [shape: f32[1,256], index: 1, kind: input, shape index: {}]   ;;  %s234_s2 = inlined_call_operand.vmem [shape: f32[1,256], index: 2, kind: input, shape index: {}]   ;;  %s235_s3 = inlined_call_operand.vmem [shape: bf16[64,256], index: 3, kind: output, shape index: {}]  }
   0x1   :  { %v14_v0 = vld [vmem:[%s232_s0] sm:$0xff]  ;;  %v15_v7 = vld [vmem:[%s232_s0 + $0x8] sm:$0xff]  ;;  %v16_v8 = vld [vmem:[%s232_s0 + $0x10] sm:$0xff] }
   0x2   :  { %v38_v1 = vld [vmem:[%s233_s1] sm:$0x3]  ;;  %v22_v3 = vunpack.c.l.bf16 %v14_v0  ;;  %v23_v4 = vunpack.c.h.bf16 %v14_v0  ;;  %v17_v9 = vld [vmem:[%s232_s0 + $0x18] sm:$0xff]  ;;  %v24_v12 = vunpack.c.l.bf16 %v15_v7  ;;  %v25_v13 = vunpack.c.h.bf16 %v15_v7  ;;  %v19_v39 = vld [vmem:[%s232_s0 + $0x28] sm:$0xff] }
   0x3   :  { %v60_v2 = vld [vmem:[%s234_s2] sm:$0x3]  ;;  %v147_v5 = vperm.slane %v38_v1, 0  ;;  %v149_v6 = vperm.slane %v38_v1, 1  ;;  %v26_v16 = vunpack.c.l.bf16 %v16_v8  ;;  %v27_v17 = vunpack.c.h.bf16 %v16_v8  ;;  %v20_v44 = vld [vmem:[%s232_s0 + $0x30] sm:$0xff]  ;;  %v21_v49 = vld [vmem:[%s232_s0 + $0x38] sm:$0xff] }
   0x4   :  { %v160_v10 = vperm.slane %v60_v2, 0  ;;  %v162_v11 = vperm.slane %v60_v2, 1  ;;  %v28_v20 = vunpack.c.l.bf16 %v17_v9  ;;  %v29_v21 = vunpack.c.h.bf16 %v17_v9  ;;  %v18_v30 = vld [vmem:[%s232_s0 + $0x20] sm:$0xff] }
   0x5   :  { %v44_v14 = vmul.f32 %v147_v5, %v22_v3  ;;  %v45_v15 = vmul.f32 %v149_v6, %v23_v4  ;;  %v46_v18 = vmul.f32 %v147_v5, %v24_v12  ;;  %v47_v19 = vmul.f32 %v149_v6, %v25_v13 }
   0x6   :  { %v48_v24 = vmul.f32 %v147_v5, %v26_v16  ;;  %v49_v25 = vmul.f32 %v149_v6, %v27_v17  ;;  %v50_v28 = vmul.f32 %v147_v5, %v28_v20  ;;  %v51_v29 = vmul.f32 %v149_v6, %v29_v21 }
   0x7   :  { %v66_v22 = vadd.f32 %v160_v10, %v44_v14  ;;  %v67_v23 = vadd.f32 %v162_v11, %v45_v15  ;;  %v68_v26 = vadd.f32 %v160_v10, %v46_v18  ;;  %v69_v27 = vadd.f32 %v162_v11, %v47_v19 }
   0x8   :  { %v70_v33 = vadd.f32 %v160_v10, %v48_v24  ;;  %v71_v34 = vadd.f32 %v162_v11, %v49_v25  ;;  %v72_v37 = vadd.f32 %v160_v10, %v50_v28  ;;  %v73_v38 = vadd.f32 %v162_v11, %v51_v29 }
   0x9   :  { %v82_v31 = vmax.f32 %v66_v22, 0.0  ;;  %v83_v32 = vmax.f32 %v67_v23, 0.0  ;;  %v84_v35 = vmax.f32 %v68_v26, 0.0  ;;  %v85_v36 = vmax.f32 %v69_v27, 0.0 }
   0xa   :  { %v86_v41 = vmax.f32 %v70_v33, 0.0  ;;  %v87_v42 = vmax.f32 %v71_v34, 0.0  ;;  %v30_v43 = vunpack.c.l.bf16 %v18_v30  ;;  %v88_v46 = vmax.f32 %v72_v37, 0.0 }
   0xb   :  { %v98_v40 = vpack.c.bf16 %v83_v32, %v82_v31  ;;  %v99_v45 = vpack.c.bf16 %v85_v36, %v84_v35  ;;  %v89_v47 = vmax.f32 %v73_v38, 0.0  ;;  %v31_v48 = vunpack.c.h.bf16 %v18_v30 }
   0xc   :  { %v100_v50 = vpack.c.bf16 %v87_v42, %v86_v41  ;;  %v52_v51 = vmul.f32 %v147_v5, %v30_v43  ;;  %v32_v52 = vunpack.c.l.bf16 %v19_v39  ;;  %v33_v53 = vunpack.c.h.bf16 %v19_v39 }
   0xd   :  { %106 = vst [vmem:[%s235_s3] sm:$0xff] %v98_v40  ;;  %v101_v54 = vpack.c.bf16 %v89_v47, %v88_v46  ;;  %v53_v55 = vmul.f32 %v149_v6, %v31_v48  ;;  %v34_v56 = vunpack.c.l.bf16 %v20_v44  ;;  %v35_v57 = vunpack.c.h.bf16 %v20_v44 }
   0xe   :  { %107 = vst [vmem:[%s235_s3 + $0x8] sm:$0xff] %v99_v45  ;;  %v74_v58 = vadd.f32 %v160_v10, %v52_v51  ;;  %v54_v59 = vmul.f32 %v147_v5, %v32_v52  ;;  %v55_v60 = vmul.f32 %v149_v6, %v33_v53  ;;  %v36_v61 = vunpack.c.l.bf16 %v21_v49 }
   0xf   :  { %108 = vst [vmem:[%s235_s3 + $0x10] sm:$0xff] %v100_v50  ;;  %v75_v62 = vadd.f32 %v162_v11, %v53_v55  ;;  %v56_v63 = vmul.f32 %v147_v5, %v34_v56  ;;  %v57_v0 = vmul.f32 %v149_v6, %v35_v57  ;;  %v37_v1 = vunpack.c.h.bf16 %v21_v49 }
  0x10   :  { %109 = vst [vmem:[%s235_s3 + $0x18] sm:$0xff] %v101_v54  ;;  %v90_v2 = vmax.f32 %v74_v58, 0.0  ;;  %v76_v3 = vadd.f32 %v160_v10, %v54_v59  ;;  %v77_v4 = vadd.f32 %v162_v11, %v55_v60  ;;  %v58_v7 = vmul.f32 %v147_v5, %v36_v61 }
  0x11   :  { %v91_v8 = vmax.f32 %v75_v62, 0.0  ;;  %v78_v9 = vadd.f32 %v160_v10, %v56_v63  ;;  %v79_v12 = vadd.f32 %v162_v11, %v57_v0  ;;  %v59_v13 = vmul.f32 %v149_v6, %v37_v1 }
  0x12   :  { %v92_v14 = vmax.f32 %v76_v3, 0.0  ;;  %v93_v15 = vmax.f32 %v77_v4, 0.0  ;;  %v80_v16 = vadd.f32 %v160_v10, %v58_v7 }
  0x13   :  { %v102_v17 = vpack.c.bf16 %v91_v8, %v90_v2  ;;  %v94_v18 = vmax.f32 %v78_v9, 0.0  ;;  %v95_v19 = vmax.f32 %v79_v12, 0.0  ;;  %v81_v20 = vadd.f32 %v162_v11, %v59_v13 }
  0x14   :  { %v103_v21 = vpack.c.bf16 %v93_v15, %v92_v14  ;;  %v96_v22 = vmax.f32 %v80_v16, 0.0 }
  0x15   :  { %110 = vst [vmem:[%s235_s3 + $0x20] sm:$0xff] %v102_v17  ;;  %v104_v5 = vpack.c.bf16 %v95_v19, %v94_v18  ;;  %v97_v23 = vmax.f32 %v81_v20, 0.0 }
  0x16   :  { %111 = vst [vmem:[%s235_s3 + $0x28] sm:$0xff] %v103_v21 }
  0x17   :  { %112 = vst [vmem:[%s235_s3 + $0x30] sm:$0xff] %v104_v5  ;;  %v105_v6 = vpack.c.bf16 %v97_v23, %v96_v22 }
  0x19   :  { %113 = vst [vmem:[%s235_s3 + $0x38] sm:$0xff] %v105_v6 }

// kernel: upsampling_block_forward.4
= control target key start
LH: loop header
LB: loop body
LE: loop exit
PB: predicated region body
PF: predicated region fallthrough
CT: control target
= control target key end

     0   :  { %s1312_s24 = smov 0   ;;  %s1314_s25 = smov 0   ;;  %s1541_s0 = inlined_call_operand.vmem [shape: bf16[2,32,16,32], index: 0, kind: input, shape index: {}, may-alias: {0,1,2}]   ;;  %s1542_s1 = inlined_call_operand.vmem [shape: bf16[2,32,16,32], index: 1, kind: input, shape index: {}, may-alias: {0,1,2}]   ;;  %s1543_s2 = inlined_call_operand.vmem [shape: bf16[2,32,16,32], index: 2, kind: input, shape index: {}, may-alias: {0,1,2}]   ;;  %s1544_s3 = inlined_call_operand.vmem [shape: f32[1,32], index: 3, kind: input, shape index: {}]   ;;  %s1545_s4 = inlined_call_operand.vmem [shape: f32[1,32], index: 4, kind: input, shape index: {}]   ;;  %s1546_s5 = inlined_call_operand.vmem [shape: bf16[288,16], index: 5, kind: input, shape index: {}]   ;;  %s1547_s6 = inlined_call_operand.vmem [shape: bf16[2,32,16,16], index: 6, kind: output, shape index: {0}]   ;;  %s1548_s7 = inlined_call_operand.vmem [shape: f32[2,32,2,16], index: 7, kind: output, shape index: {1}]  }
   0x1   :  { %s1316_s26 = smov 0   ;;  %s1318_s27 = smov 0  }
   0x2   :  { %s1320_s28 = smov 0  }
   0x3 LB: > { %s27_s29 = sadd.s32 1, %s1259_s26  ;;  %s30_s30 = sadd.s32 1, %s1263_s27  ;;  %s1267_s28 = sphi %s1320_s28, %s18_s28   ;;  %s1263_s27 = sphi %s1318_s27, %s1555_s27   ;;  %s1259_s26 = sphi %s1316_s26, %s1554_s26   ;;  %s1255_s25 = sphi %s1314_s25, %s1553_s25   ;;  %s1251_s24 = sphi %s1312_s24, %s1552_s24  }
   0x4   : > { %p28_p0 = scmp.ge.s32.totalorder %s27_s29, 32  ;;  %p1053_p1 = scmp.ge.s32.totalorder %s1267_s28, 1 }
   0x5   : > { %p318_p2 = scmp.lt.s32.totalorder %s1267_s28, 65 }
   0x6   : > { %s1557_s29 = smov (%p28_p0, %s27_s29), 0  ;;  %s1559_s30 = smov (!%p28_p0, %s30_s30), %s1263_s27 }
   0x7   : > { %p319_p3 = pnand %p1053_p1, %p318_p2  ;;  %p32_p4 = scmp.ge.s32.totalorder %s1559_s30, 2 }
   0x8   : > { %p393_p5 = scmp.lt.s32.totalorder (!%p319_p3), %s1255_s25, 1  ;;  %p407_p6 = scmp.lt.s32.totalorder (!%p319_p3), %s1251_s24, 31 }
   0x9   : > { %s1561_s30 = smov (%p32_p4, %s1559_s30), 0  ;;  %322 = sbr.rel (%p319_p3) target bundleno = 446 (0x1be), region = 44 }
   0xa   : > { %s414_s10 = sadd.s32 (!%p319_p3), 1, %s1251_s24  ;;  %p584_p8 = scmp.le.s32.totalorder (!%p319_p3), %s1251_s24, 30 }
   0xb   : > { %p1355_p7 = scmp.lt.s32.totalorder (!%p319_p3), %s414_s10, 31  ;;  %s1270_s19 = smov (!%p319_p3), 64  }
   0xc   : > { %s1054_s20 = sadd.s32 (!%p319_p3), 4294967295, %s1251_s24  ;;  %p465_p11 = scmp.ge.s32.totalorder (!%p319_p3), %s1251_s24, 1 }
   0xd   : > { %p391_p9 = scmp.gt.s32.totalorder (!%p319_p3), %s1054_s20, 0  ;;  %p1055_p10 = scmp.lt.s32.totalorder (!%p319_p3), %s1054_s20, 31 }
   0xe   : > { %s1563_s25 = smov (!%p393_p5, %s1255_s25), 1  ;;  %v1371_v0 = vld [vmem:[%s1544_s3] ss:$0 sm:$0xff]  ;;  %s1565_s10 = smov (!%p1355_p7, %s414_s10), 31  ;;  %vm487_vm0 = vcmask 1040384   ;;  %vm509_vm4 = vcmask 1046528  }
   0xf   : > { %s1348_s8 = scalar_select %p407_p6, %s1251_s24, 31  ;;  %v1379_v2 = vld [vmem:[%s1545_s4] ss:$0 sm:$0xff]  ;;  %vm488_vm1 = vsmask.f32 256  ;;  %v1160_v31 = vld [vmem:[%s1546_s5 + $0x30] sm:$0xff] }
  0x10   : > { %s1351_s9 = sshll.u32 %s1563_s25, 6  ;;  %s1567_s10 = smov (!%p1355_p7, %s1565_s10), 31  ;;  %vm1395_vm2 = vmand %vm487_vm0, %vm488_vm1  ;;  %vm492_vm3 = vsmask.f32 7424  ;;  %vm515_vm5 = vcmask 261120   ;;  %vm518_vm6 = vcmask 523264  }
  0x11   : > { %s1063_s11 = sshll.u32 %s1348_s8, 1  ;;  %s1069_s23 = sshll.u32 %s1567_s10, 1  ;;  %vm639_vm7 = vcmask 785408   ;;  %vm860_vm8 = vcmask 125952   ;;  %vm834_vm9 = vcmask 130048   ;;  %vm844_vm10 = vcmask 122880  }
  0x12   : > { %s1360_s13 = sadd.s32 %s1063_s11, %s1351_s9  ;;  %s423_s11 = sadd.s32 %s1069_s23, %s1351_s9 }
  0x13   : > { %s1065_s14 = sshll.u32 %s1360_s13, 2  ;;  %s1071_s15 = sshll.u32 %s423_s11, 2 }
  0x14   : > { %s413_s17 = scalar_lea.vmem %s1542_s1, %s1065_s14  ;;  %s425_s18 = scalar_lea.vmem %s1543_s2, %s1071_s15 }
  0x15   : > { %v1177_v1 = vld [vmem:[%s413_s17] sm:$0xff]   ;;  %s585_s22 = scalar_select %p584_p8, 1, 0 }
  0x16   : > { %v1178_v3 = vunpack.c.l.bf16 %v1177_v1  ;;  %v1179_v4 = vunpack.c.h.bf16 %v1177_v1  ;;  %v1181_v11 = vld [vmem:[%s425_s18] sm:$0xff]   ;;  %s1269_s10 = smov 32   ;;  %s1569_s20 = smov (!%p391_p9, %s1054_s20), 0 }
  0x17   : > { %v1182_v14 = vunpack.c.l.bf16 %v1181_v11  ;;  %v1183_v15 = vunpack.c.h.bf16 %v1181_v11  ;;  %s586_s12 = scvt.s32.f32 %s585_s22  ;;  %s1571_s20 = smov (!%p1055_p10, %s1569_s20), 31 }
  0x18   : > { %v525_v5 = vmul.f32 %v1371_v0, %v1178_v3  ;;  %v526_v6 = vmul.f32 %v1371_v0, %v1179_v4  ;;  %s1060_s21 = sshll.u32 %s1571_s20, 1  ;;  %s1075_s13 = sshll.u32 %s1563_s25, 5 }
  0x19   : > { %v578_v18 = vmul.f32 %v1371_v0, %v1182_v14  ;;  %v579_v19 = vmul.f32 %v1371_v0, %v1183_v15  ;;  %v587_v23 = vstv %s586_s12  ;;  %s399_s22 = sadd.s32 %s1351_s9, %s1060_s21  ;;  %s1271_s21 = smov 96  }
  0x1a   : > { %v527_v7 = vadd.f32 %v1379_v2, %v525_v5  ;;  %v528_v8 = vadd.f32 %v1379_v2, %v526_v6  ;;  %s1062_s23 = sshll.u32 %s399_s22, 2 }
  0x1b   : > { %v580_v21 = vadd.f32 %v1379_v2, %v578_v18  ;;  %v581_v22 = vadd.f32 %v1379_v2, %v579_v19  ;;  %s401_s16 = scalar_lea.vmem %s1541_s0, %s1062_s23 }
  0x1c   : > { %v529_v9 = vmax.f32 %v527_v7, 0.0  ;;  %v530_v10 = vmax.f32 %v528_v8, 0.0  ;;  %v1173_v4 = vld [vmem:[%s401_s16] sm:$0xff]   ;;  %s466_s17 = scalar_select %p465_p11, 1, 0 }
  0x1d   : > { %v582_v26 = vmax.f32 %v580_v21, 0.0  ;;  %v583_v27 = vmax.f32 %v581_v22, 0.0  ;;  %v1174_v5 = vunpack.c.l.bf16 %v1173_v4  ;;  %v1175_v6 = vunpack.c.h.bf16 %v1173_v4 }
  0x1e   : > { %v531_v12 = vpack.c.bf16 %v529_v9, %v529_v9  ;;  %v532_v13 = vpack.c.bf16 %v530_v10, %v530_v10  ;;  %s467_s18 = scvt.s32.f32 %s466_s17 }
  0x1f   : > { %v588_v29 = vmul.f32 %v587_v23, %v582_v26  ;;  %v589_v30 = vmul.f32 %v587_v23, %v583_v27  ;;  %v455_v7 = vmul.f32 %v1371_v0, %v1174_v5  ;;  %v456_v8 = vmul.f32 %v1371_v0, %v1175_v6 }
  0x20   : > { %v535_v16 = vunpack.c.l.b16 %v531_v12  ;;  %v536_v17 = vunpack.c.l.b16 %v532_v13  ;;  %v468_v13 = vstv %s467_s18 }
  0x21   : > { %v590_v34 = vpack.c.bf16 %v588_v29, %v588_v29  ;;  %v591_v35 = vpack.c.bf16 %v589_v30, %v589_v30  ;;  %v461_v9 = vadd.f32 %v1379_v2, %v455_v7  ;;  %v462_v10 = vadd.f32 %v1379_v2, %v456_v8  ;;  %v1169_v29 = vld [vmem:[%s1546_s5 + $0x78] sm:$0xff]  ;;  %v1171_v30 = vld [vmem:[%s1546_s5 + $0x88] sm:$0xff] }
  0x22   : > { %v537_v20 = vpack.c.b16 %v536_v17, %v535_v16  ;;  %806 = vmatpush.bf16.msra.mxu1 %v1169_v29  ;;  %826 = vmatpush.bf16.msra.mxu2 %v1171_v30 }
  0x23   : > { %v594_v38 = vunpack.c.l.b16 %v590_v34  ;;  %v595_v39 = vunpack.c.l.b16 %v591_v35  ;;  %v463_v11 = vmax.f32 %v461_v9, 0.0  ;;  %v464_v12 = vmax.f32 %v462_v10, 0.0  ;;  %v1159_v35 = vld [vmem:[%s1546_s5 + $0x28] sm:$0xff] }
  0x24   : > { %v539_v24 = vshrl.u32 %v537_v20, 16  ;;  %v542_v25 = vshll.u32 %v537_v20, 16 }
  0x25   : > { %v596_v42 = vpack.c.b16 %v595_v39, %v594_v38  ;;  %v469_v14 = vmul.f32 %v468_v13, %v463_v11  ;;  %v470_v15 = vmul.f32 %v468_v13, %v464_v12 }
  0x26   : > { %v541_v28 = vrot.slane %v539_v24, 7 }
  0x27   : > { %v598_v45 = vshrl.u32 %v596_v42, 16  ;;  %v601_v46 = vshll.u32 %v596_v42, 16  ;;  %v471_v16 = vpack.c.bf16 %v469_v14, %v469_v14  ;;  %v472_v17 = vpack.c.bf16 %v470_v15, %v470_v15 }
  0x28   : > { %v544_v32 = vor.u32 %v542_v25, %v541_v28  ;;  %v548_v33 = vsel %vm1395_vm2, %v541_v28, 0  ;;  %v1161_v28 = vld [vmem:[%s1546_s5 + $0x38] sm:$0xff] }
  0x29   : > { %v557_v36 = vshll.u32 %v548_v33, 16  ;;  %v600_v48 = vrot.slane %v598_v45, 7  ;;  %v566_v54 = vrot.slane %v548_v33, 1  ;;  %v475_v18 = vunpack.c.l.b16 %v471_v16  ;;  %792 = vmatpush.bf16.msra.mxu0 %v1161_v28  ;;  %v1170_v33 = vld [vmem:[%s1546_s5 + $0x80] sm:$0xff] }
  0x2a   : > { %v1403_v37 = vsel %vm1395_vm2, 0, %v544_v32  ;;  %v476_v19 = vunpack.c.l.b16 %v472_v17  ;;  %v1168_v32 = vld [vmem:[%s1546_s5 + $0x70] sm:$0xff]  ;;  %827 = vmatpush.bf16.msra.mxu2 %v1170_v33 }
  0x2b   : > { %v550_v40 = vshrl.u32 %v1403_v37, 16  ;;  %v552_v41 = vshll.u32 %v1403_v37, 16  ;;  %v559_v44 = vrot.slane %v557_v36, 1  ;;  %v603_v50 = vor.u32 %v601_v46, %v600_v48  ;;  %807 = vmatpush.bf16.msra.mxu1 %v1168_v32  ;;  %v1167_v36 = vld [vmem:[%s1546_s5 + $0x68] sm:$0xff] }
  0x2c   : > { %v607_v51 = vsel %vm1395_vm2, %v600_v48, 0  ;;  %v565_v53 = vrot.slane %v1403_v37, 1  ;;  %v477_v20 = vpack.c.b16 %v476_v19, %v475_v18 }
  0x2d   : > { %v554_v43 = vrot.slane %v552_v41, 1  ;;  %v616_v52 = vshll.u32 %v607_v51, 16  ;;  %v1414_v55 = vsel %vm1395_vm2, 0, %v603_v50  ;;  %v625_v1 = vrot.slane %v607_v51, 1  ;;  %793 = vmatpush.bf16.msra.mxu0 %v1160_v31  ;;  %v1158_v51 = vld [vmem:[%s1546_s5 + $0x20] sm:$0xff] }
  0x2e   : > { %v609_v56 = vshrl.u32 %v1414_v55, 16  ;;  %v611_v57 = vshll.u32 %v1414_v55, 16  ;;  %v567_v60 = vsel %vm509_vm4, %v565_v53, %v566_v54  ;;  %v624_v63 = vrot.slane %v1414_v55, 1  ;;  %v1157_v53 = vld [vmem:[%s1546_s5 + $0x18] sm:$0xff] }
  0x2f   : > { %v555_v47 = vor.u32 %v554_v43, %v550_v40  ;;  %v618_v59 = vrot.slane %v616_v52, 1  ;;  %v479_v21 = vshrl.u32 %v477_v20, 16  ;;  %v482_v23 = vshll.u32 %v477_v20, 16  ;;  %808 = vmatpush.bf16.msra.mxu1 %v1167_v36  ;;  %v1166_v52 = vld [vmem:[%s1546_s5 + $0x60] sm:$0xff]  ;;  %v1165_v54 = vld [vmem:[%s1546_s5 + $0x58] sm:$0xff] }
  0x30   : > { %v613_v58 = vrot.slane %v611_v57, 1  ;;  %v626_v3 = vsel %vm509_vm4, %v624_v63, %v625_v1  ;;  %v1155_v57 = vld [vmem:[%s1546_s5 + $0x8] sm:$0xff] }
  0x31   : > { %v560_v49 = vsel %vm492_vm3, %v555_v47, %v559_v44  ;;  %v481_v22 = vrot.slane %v479_v21, 7  ;;  %794 = vmatpush.bf16.msra.mxu0 %v1159_v35 }
  0x32   : > { %561 = vrot.lane.b32.xlu1 %v560_v49, %s1269_s10  ;;  %v614_v61 = vor.u32 %v613_v58, %v609_v56  ;;  %v1164_v56 = vld [vmem:[%s1546_s5 + $0x50] sm:$0xff]  ;;  %v1163_v58 = vld [vmem:[%s1546_s5 + $0x48] sm:$0xff] }
  0x33   : > { %v484_v24 = vor.u32 %v482_v23, %v481_v22  ;;  %v491_v2 = vsel %vm1395_vm2, %v481_v22, 0  ;;  %809 = vmatpush.bf16.msra.mxu1 %v1166_v52 }
  0x34   : > { %v619_v62 = vsel %vm492_vm3, %v614_v61, %v618_v59  ;;  %v511_v26 = vrot.slane %v491_v2, 1  ;;  %v501_v46 = vshll.u32 %v491_v2, 16  ;;  %v1154_v59 = vld [vmem:[%s1546_s5] sm:$0xff] }
  0x35   : > { %620 = vrot.lane.b32.xlu0 %v619_v62, %s1269_s10  ;;  %v1437_v0 = vsel %vm1395_vm2, 0, %v484_v24  ;;  %795 = vmatpush.bf16.msra.mxu0 %v1158_v51 }
  0x36   : > { %v510_v25 = vrot.slane %v1437_v0, 1  ;;  %v496_v42 = vshll.u32 %v1437_v0, 16  ;;  %v494_v44 = vshrl.u32 %v1437_v0, 16  ;;  %v503_v49 = vrot.slane %v501_v46, 1 }
  0x37   : > { %810 = vmatpush.bf16.msra.mxu1 %v1165_v54 }
  0x38   : > { %v512_v27 = vsel %vm509_vm4, %v510_v25, %v511_v26  ;;  %v498_v45 = vrot.slane %v496_v42, 1 }
  0x39   : > { %796 = vmatpush.bf16.msra.mxu0 %v1157_v53 }
  0x3a   : > { %568 = vrot.lane.b32.xlu1 %v567_v60, %s1270_s19  ;;  %v1162_v60 = vld [vmem:[%s1546_s5 + $0x40] sm:$0xff] }
  0x3b   : > { %811 = vmatpush.bf16.msra.mxu1 %v1164_v56 }
  0x3d   : > { %627 = vrot.lane.b32.xlu0 %v626_v3, %s1270_s19 }
  0x3f   : > { %812 = vmatpush.bf16.msra.mxu1 %v1163_v58 }
  0x43   : > { %813 = vmatpush.bf16.msra.mxu1 %v1162_v60 }
  0x45   : > { %513 = vrot.lane.b32.xlu0 %v512_v27, %s1270_s19 }
  0xa4   : > { %v562_v34 = vpop.permute.xlu1 %561 }
  0xa5   : > { %v571_v38 = vsel %vm515_vm5, %v1403_v37, %v562_v34  ;;  %v499_v37 = vor.u32 %v498_v45, %v494_v44 }
  0xa7   : > { %v621_v41 = vpop.permute.xlu0 %620  ;;  %v504_v50 = vsel %vm492_vm3, %v499_v37, %v503_v49 }
  0xa8   : > { %v630_v43 = vsel %vm515_vm5, %v1414_v55, %v621_v41  ;;  %v1156_v55 = vld [vmem:[%s1546_s5 + $0x10] sm:$0xff] }
  0xa9   : > { %797 = vmatpush.bf16.msra.mxu0 %v1156_v55 }
  0xac   : > { %v569_v39 = vpop.permute.xlu1 %568 }
  0xad   : > { %v573_v40 = vsel %vm518_vm6, %v571_v38, %v569_v39  ;;  %798 = vmatpush.bf16.msra.mxu0 %v1155_v57 }
  0xae   : > { %634 = vrot.lane.b32.xlu1 %v573_v40, %s1271_s21 }
  0xaf   : > { %v628_v47 = vpop.permute.xlu0 %627 }
  0xb0   : > { %v632_v48 = vsel %vm518_vm6, %v630_v43, %v628_v47 }
  0xb1   : > { %637 = vrot.lane.b32.xlu2 %v632_v48, %s1270_s19  ;;  %799 = vmatpush.bf16.msra.mxu0 %v1154_v59 }
  0xb7   : > { %v514_v1 = vpop.permute.xlu0 %513 }
  0xb9   : > { %505 = vrot.lane.b32.xlu2 %v504_v50, %s1269_s10  ;;  %s437_s10 = scalar_lea.vmem %s1547_s6, %s1065_s14  ;;  %s443_s14 = sadd.s32 %s1075_s13, %s1348_s8 }
  0xba   : > { %s1076_s24 = sshll.u32 %s443_s14, 1 }
  0xbb   : > { %s445_s20 = scalar_lea.vmem %s1548_s7, %s1076_s24 }
 0x10b   : > { %v638_v61 = vpop.permute.xlu2 %637 }
 0x10c   : > { %1149 = vmatmul.msk.bf16.vlgmr.msra.gmra.mxu2 %vm515_vm5, %v638_v61 }
 0x113   : > { %v506_v62 = vpop.permute.xlu2 %505 }
 0x114   : > { %v517_v63 = vsel %vm515_vm5, %v1437_v0, %v506_v62 }
 0x115   : > { %v520_v3 = vsel %vm518_vm6, %v517_v63, %v514_v1 }
 0x120   : > { %v635_v4 = vpop.permute.xlu1 %634 }
 0x121   : > { %v641_v5 = vsel %vm639_vm7, %v520_v3, %v635_v4  ;;  %v644_v6 = vsel %vm518_vm6, %v635_v4, %v638_v61 }
 0x122   : > { %800 = vmatmul.bf16.vlgmr.msra.gmra.mxu0 %v641_v5  ;;  %814 = vmatmul.bf16.vlgmr.msra.gmra.mxu1 %v644_v6 }
 0x18f   : > { %v829_v7 = vpop.f32.mrf.mxu2 }
 0x197   : > { %v831_v16 = vpop.f32.mrf.mxu2 }
 0x19f   : > { %v801_v8 = vpop.f32.mrf.mxu0  ;;  %v815_v9 = vpop.f32.mrf.mxu1 }
 0x1a0   : > { %v816_v10 = vadd.f32 %v815_v9, %v801_v8 }
 0x1a2   : > { %v830_v11 = vadd.f32 %v829_v7, %v816_v10 }
 0x1a4   : > { %v858_v12 = vpack.c.bf16 %v830_v11, %v830_v11  ;;  %v846_v17 = vmul.f32 %v830_v11, %v830_v11  ;;  %v835_v19 = vsel %vm834_vm9, %v830_v11, 0.0 }
 0x1a6   : > { %861 = vst.msk [vmem:[%s437_s10] sm:$0xf] %vm860_vm8, %v858_v12  ;;  %v848_v24 = vsel %vm834_vm9, %v846_v17, 0.0 }
 0x1a7   : > { %v803_v13 = vpop.f32.mrf.mxu0  ;;  %v817_v14 = vpop.f32.mrf.mxu1 }
 0x1a8   : > { %v818_v15 = vadd.f32 %v817_v14, %v803_v13 }
 0x1aa   : > { %v832_v18 = vadd.f32 %v831_v16, %v818_v15 }
 0x1ac   : > { %v836_v20 = vsel %vm834_vm9, %v832_v18, 0.0  ;;  %v847_v21 = vmul.f32 %v832_v18, %v832_v18  ;;  %v859_v22 = vpack.c.bf16 %v832_v18, %v832_v18 }
 0x1ad   : > { %v837_v23 = vadd.f32 %v836_v20, %v835_v19 }
 0x1ae   : > { %v849_v0 = vsel %vm834_vm9, %v847_v21, 0.0  ;;  %862 = vst.msk [vmem:[%s437_s10 + $0x4] sm:$0xf] %vm860_vm8, %v859_v22 }
 0x1af   : > { %v838_v2 = vrot.slane %v837_v23, 4  ;;  %v850_v25 = vadd.f32 %v849_v0, %v848_v24 }
 0x1b1   : > { %v839_v26 = vadd.f32 %v838_v2, %v837_v23  ;;  %v851_v27 = vrot.slane %v850_v25, 4 }
 0x1b3   : > { %v840_v28 = vrot.slane %v839_v26, 2  ;;  %v852_v29 = vadd.f32 %v851_v27, %v850_v25 }
 0x1b5   : > { %v841_v30 = vadd.f32 %v840_v28, %v839_v26  ;;  %v853_v31 = vrot.slane %v852_v29, 2 }
 0x1b7   : > { %v842_v32 = vrot.slane %v841_v30, 1  ;;  %v854_v33 = vadd.f32 %v853_v31, %v852_v29 }
 0x1b9   : > { %v843_v34 = vadd.f32 %v842_v32, %v841_v30  ;;  %v855_v35 = vrot.slane %v854_v33, 1 }
 0x1bb   : > { %845 = vst.msk [vmem:[%s445_s20] sm:$0x1] %vm844_vm10, %v843_v34  ;;  %v856_v36 = vadd.f32 %v855_v35, %v854_v33 }
 0x1bd   : > { %857 = vst.msk [vmem:[%s445_s20 + $0x1] sm:$0x1] %vm844_vm10, %v856_v36 }
 0x1be PF: > { %s18_s28 = sadd.s32 1, %s1267_s28   ;;  %s1552_s24 = smov %s1259_s26 }
 0x1bf   : > { %p15_p12 = scmp.ge.s32.totalorder %s18_s28, 66   ;;  %s1553_s25 = smov %s1263_s27 }
 0x1c0   : > { %s1554_s26 = smov %s1557_s29  ;;  %s1555_s27 = smov %s1561_s30 }
 0x1c1   :  { %17 = sbr.rel (!%p15_p12) target bundleno = 3 (0x3), region = 92 }

</bundles_post_ra>
